<compile_context>
chip_gen: v6e
topology: v6e:2x2x1
jax: 0.10.0
libtpu: 0.0.40
codegen_flags: <defaults>
</compile_context>

<pallas_src>
import math

import jax
import jax.numpy as jnp
from jax import lax
from jax.experimental import pallas as pl
from jax.experimental.pallas import tpu as pltpu

# ----------------------------- config (small, synthetic RoBERTa) ------------
VOCAB = 50
HIDDEN = 32
NUM_HEADS = 4
HEAD_DIM = HIDDEN // NUM_HEADS
FFN = 64
NUM_LAYERS = 2
MAX_POS = 40
PAD_IDX = 1           # RoBERTa padding_idx
LN_EPS = 1e-5
MASK_BIAS_VALUE = -10000.0
_INV_SQRT2 = 1.0 / math.sqrt(2.0)


# ----------------------------- fused encoder kernel -------------------------
def _make_fused_kernel(num_layers, B, S, H, nH, dh):
    scale = 1.0 / math.sqrt(dh)

    def _ln(x, g, b):
        mu = jnp.mean(x, axis=-1, keepdims=True)
        d = x - mu
        var = jnp.mean(d * d, axis=-1, keepdims=True)
        return d * lax.rsqrt(var + LN_EPS) * g + b

    def kernel(emb_ref, mask_ref, eg_ref, eb_ref,
               wqkv_ref, bqkv_ref, wo_ref, bo_ref, ln1g_ref, ln1b_ref,
               w1_ref, b1_ref, w2_ref, b2_ref, ln2g_ref, ln2b_ref,
               o_ref):
        # embeddings LayerNorm
        x = _ln(emb_ref[...], eg_ref[...], eb_ref[...])      # (B*S, H)
        mask_bias = mask_ref[...]                             # (B, S) additive bias

        for l in range(num_layers):
            # ---- fused QKV projection: one (B*S,H) @ (H,3H) MXU push -------
            qkv = jnp.dot(x, wqkv_ref[l],
                          preferred_element_type=jnp.float32) + bqkv_ref[l]

            # ---- multi-head attention (static loop over batch x head) -----
            ctx_rows = []
            for b in range(B):
                r0 = b * S
                bias = mask_bias[b:b + 1, :]                  # (1, S) key bias
                head_ctx = []
                for h in range(nH):
                    c0 = h * dh
                    q = qkv[r0:r0 + S, c0:c0 + dh]            # (S, dh)
                    k = qkv[r0:r0 + S, H + c0:H + c0 + dh]    # (S, dh)
                    v = qkv[r0:r0 + S, 2 * H + c0:2 * H + c0 + dh]
                    s = jnp.dot(q, k.T,
                                preferred_element_type=jnp.float32) * scale + bias
                    s = s - jnp.max(s, axis=-1, keepdims=True)
                    p = jnp.exp(s)
                    denom = jnp.sum(p, axis=-1, keepdims=True)
                    p = p * pl.reciprocal(denom, approx=True)
                    head_ctx.append(
                        jnp.dot(p, v, preferred_element_type=jnp.float32))
                ctx_rows.append(jnp.concatenate(head_ctx, axis=1))   # (S, H)
            ctx = jnp.concatenate(ctx_rows, axis=0)                   # (B*S, H)

            # ---- output projection + fused residual + LayerNorm -----------
            attn_out = jnp.dot(ctx, wo_ref[l],
                               preferred_element_type=jnp.float32) + bo_ref[l]
            x = _ln(x + attn_out, ln1g_ref[l], ln1b_ref[l])

            # ---- FFN (exact erf GELU, matching HF RoBERTa) -----------------
            hmid = jnp.dot(x, w1_ref[l],
                           preferred_element_type=jnp.float32) + b1_ref[l]
            hmid = 0.5 * hmid * (1.0 + lax.erf(hmid * _INV_SQRT2))
            ffn_out = jnp.dot(hmid, w2_ref[l],
                              preferred_element_type=jnp.float32) + b2_ref[l]
            x = _ln(x + ffn_out, ln2g_ref[l], ln2b_ref[l])

        o_ref[...] = x

    return kernel


def _full_spec(shape):
    zeros = (0,) * len(shape)
    return pl.BlockSpec(shape, lambda i, _z=zeros: _z)


def fused_encoder(params, emb, mask_bias):
    """Single-kernel RoBERTa encoder: emb LN + NUM_LAYERS transformer layers."""
    N, H = emb.shape
    B, S = mask_bias.shape
    L = params["w_qkv"].shape[0]

    inputs = [
        emb, mask_bias,
        params["emb_ln_g"], params["emb_ln_b"],
        params["w_qkv"], params["b_qkv"],
        params["wo"], params["bo"],
        params["ln1_g"], params["ln1_b"],
        params["w1"], params["b1"],
        params["w2"], params["b2"],
        params["ln2_g"], params["ln2_b"],
    ]
    return pl.pallas_call(
        _make_fused_kernel(L, B, S, H, NUM_HEADS, HEAD_DIM),
        out_shape=jax.ShapeDtypeStruct((N, H), jnp.float32),
        grid=(1,),
        in_specs=[_full_spec(a.shape) for a in inputs],
        out_specs=_full_spec((N, H)),
        compiler_params=pltpu.CompilerParams(
            dimension_semantics=("arbitrary",)),   # single TC; no cross-core split
    )(*inputs)


# ----------------------------- params ----------------------------------------
def init_params(key):
    def nrm(k, shape):
        return 0.02 * jax.random.normal(k, shape, dtype=jnp.float32)

    keys = jax.random.split(key, 4 + NUM_LAYERS)
    params = {
        "word_emb": nrm(keys[0], (VOCAB, HIDDEN)),
        "pos_emb": nrm(keys[1], (MAX_POS, HIDDEN)),
        "type_emb": nrm(keys[2], (1, HIDDEN)),
        "emb_ln_g": jnp.ones((1, HIDDEN), jnp.float32),
        "emb_ln_b": jnp.zeros((1, HIDDEN), jnp.float32),
    }

    w_qkv, b_qkv = [], []
    wo, bo = [], []
    ln1g, ln1b = [], []
    w1, b1, w2, b2 = [], [], [], []
    ln2g, ln2b = [], []
    for l in range(NUM_LAYERS):
        lk = jax.random.split(keys[4 + l], 6)
        wq = nrm(lk[0], (HIDDEN, HIDDEN))
        wk = nrm(lk[1], (HIDDEN, HIDDEN))
        wv = nrm(lk[2], (HIDDEN, HIDDEN))
        w_qkv.append(jnp.concatenate([wq, wk, wv], axis=1))          # (H, 3H)
        b_qkv.append(jnp.zeros((1, 3 * HIDDEN), jnp.float32))
        wo.append(nrm(lk[3], (HIDDEN, HIDDEN)))
        bo.append(jnp.zeros((1, HIDDEN), jnp.float32))
        ln1g.append(jnp.ones((1, HIDDEN), jnp.float32))
        ln1b.append(jnp.zeros((1, HIDDEN), jnp.float32))
        w1.append(nrm(lk[4], (HIDDEN, FFN)))
        b1.append(jnp.zeros((1, FFN), jnp.float32))
        w2.append(nrm(lk[5], (FFN, HIDDEN)))
        b2.append(jnp.zeros((1, HIDDEN), jnp.float32))
        ln2g.append(jnp.ones((1, HIDDEN), jnp.float32))
        ln2b.append(jnp.zeros((1, HIDDEN), jnp.float32))

    params.update({
        "w_qkv": jnp.stack(w_qkv), "b_qkv": jnp.stack(b_qkv),
        "wo": jnp.stack(wo), "bo": jnp.stack(bo),
        "ln1_g": jnp.stack(ln1g), "ln1_b": jnp.stack(ln1b),
        "w1": jnp.stack(w1), "b1": jnp.stack(b1),
        "w2": jnp.stack(w2), "b2": jnp.stack(b2),
        "ln2_g": jnp.stack(ln2g), "ln2_b": jnp.stack(ln2b),
    })
    return params


# ----------------------------- forward ----------------------------------------
@jax.jit
def roberta_embedder_forward(params, input_seq, attn_mask):
    """Equivalent of RobertaEmbedder.forward: returns last hidden state [B, S, H]."""
    B, S = input_seq.shape

    # RoBERTa position ids: cumsum over non-pad tokens, offset by padding_idx.
    # TODO(synk): embedding-table gathers + cumsum are left to plain JAX (no
    # rectangular BlockSpec equivalent at these tiny vocab-gather sizes); they
    # fuse under jit anyway.
    nonpad = (input_seq != PAD_IDX).astype(jnp.int32)
    pos_ids = jnp.cumsum(nonpad, axis=1) * nonpad + PAD_IDX

    we = jnp.take(params["word_emb"], input_seq, axis=0)      # [B, S, H]
    pe = jnp.take(params["pos_emb"], pos_ids, axis=0)         # [B, S, H]
    te = params["type_emb"][0]                                 # [H] (token_type_id == 0)
    emb = (we + pe + te).reshape(B * S, HIDDEN)

    # extended attention mask bias: (1 - mask) * -10000 per key position
    mask_bias = (1.0 - attn_mask.astype(jnp.float32)) * MASK_BIAS_VALUE   # [B, S]

    x = fused_encoder(params, emb, mask_bias)                  # [B*S, H]
    return x.reshape(B, S, HIDDEN)


# ----------------------------- main ------------------------------------------
if __name__ == "__main__":
    key = jax.random.PRNGKey(0)
    pkey, ikey = jax.random.split(key)

    params = init_params(pkey)

    B, S = 2, 8
    input_seq = jax.random.randint(ikey, (B, S), 2, VOCAB, dtype=jnp.int32)
    # pad the tail of the second sequence
    input_seq = input_seq.at[1, 6:].set(PAD_IDX)
    attn_mask = (input_seq != PAD_IDX).astype(jnp.int32)

    out = roberta_embedder_forward(params, input_seq, attn_mask)
    out = jax.block_until_ready(out)

    assert out.shape == (B, S, HIDDEN)
    assert bool(jnp.all(jnp.isfinite(out)))
    print("KERNEL_OK")
</pallas_src>

<mosaic_0001>
module attributes {stable_mosaic.version = 11 : i64} {
  func.func @kernel(%arg0: i32, %arg1: memref<16x32xf32, #tpu.memory_space<vmem>>, %arg2: memref<2x8xf32, #tpu.memory_space<vmem>>, %arg3: memref<1x32xf32, #tpu.memory_space<vmem>>, %arg4: memref<1x32xf32, #tpu.memory_space<vmem>>, %arg5: memref<2x32x96xf32, #tpu.memory_space<vmem>>, %arg6: memref<2x1x96xf32, #tpu.memory_space<vmem>>, %arg7: memref<2x32x32xf32, #tpu.memory_space<vmem>>, %arg8: memref<2x1x32xf32, #tpu.memory_space<vmem>>, %arg9: memref<2x1x32xf32, #tpu.memory_space<vmem>>, %arg10: memref<2x1x32xf32, #tpu.memory_space<vmem>>, %arg11: memref<2x32x64xf32, #tpu.memory_space<vmem>>, %arg12: memref<2x1x64xf32, #tpu.memory_space<vmem>>, %arg13: memref<2x64x32xf32, #tpu.memory_space<vmem>>, %arg14: memref<2x1x32xf32, #tpu.memory_space<vmem>>, %arg15: memref<2x1x32xf32, #tpu.memory_space<vmem>>, %arg16: memref<2x1x32xf32, #tpu.memory_space<vmem>>, %arg17: memref<16x32xf32, #tpu.memory_space<vmem>>) attributes {dimension_semantics = [#tpu.dimension_semantics<arbitrary>], iteration_bounds = array<i64: 1>, scalar_prefetch = 0 : i64, scratch_operands = 0 : i64, tpu.core_type = #tpu.core_type<tc>, window_params = [{pipeline_mode = #tpu.pipeline_mode<synchronous>, transform_indices = @transform_0, window_bounds = array<i64: 16, 32>}, {pipeline_mode = #tpu.pipeline_mode<synchronous>, transform_indices = @transform_1, window_bounds = array<i64: 2, 8>}, {pipeline_mode = #tpu.pipeline_mode<synchronous>, transform_indices = @transform_2, window_bounds = array<i64: 1, 32>}, {pipeline_mode = #tpu.pipeline_mode<synchronous>, transform_indices = @transform_3, window_bounds = array<i64: 1, 32>}, {pipeline_mode = #tpu.pipeline_mode<synchronous>, transform_indices = @transform_4, window_bounds = array<i64: 2, 32, 96>}, {pipeline_mode = #tpu.pipeline_mode<synchronous>, transform_indices = @transform_5, window_bounds = array<i64: 2, 1, 96>}, {pipeline_mode = #tpu.pipeline_mode<synchronous>, transform_indices = @transform_6, window_bounds = array<i64: 2, 32, 32>}, {pipeline_mode = #tpu.pipeline_mode<synchronous>, transform_indices = @transform_7, window_bounds = array<i64: 2, 1, 32>}, {pipeline_mode = #tpu.pipeline_mode<synchronous>, transform_indices = @transform_8, window_bounds = array<i64: 2, 1, 32>}, {pipeline_mode = #tpu.pipeline_mode<synchronous>, transform_indices = @transform_9, window_bounds = array<i64: 2, 1, 32>}, {pipeline_mode = #tpu.pipeline_mode<synchronous>, transform_indices = @transform_10, window_bounds = array<i64: 2, 32, 64>}, {pipeline_mode = #tpu.pipeline_mode<synchronous>, transform_indices = @transform_11, window_bounds = array<i64: 2, 1, 64>}, {pipeline_mode = #tpu.pipeline_mode<synchronous>, transform_indices = @transform_12, window_bounds = array<i64: 2, 64, 32>}, {pipeline_mode = #tpu.pipeline_mode<synchronous>, transform_indices = @transform_13, window_bounds = array<i64: 2, 1, 32>}, {pipeline_mode = #tpu.pipeline_mode<synchronous>, transform_indices = @transform_14, window_bounds = array<i64: 2, 1, 32>}, {pipeline_mode = #tpu.pipeline_mode<synchronous>, transform_indices = @transform_15, window_bounds = array<i64: 2, 1, 32>}, {pipeline_mode = #tpu.pipeline_mode<synchronous>, transform_indices = @transform_16, window_bounds = array<i64: 16, 32>}]} {
    %c0 = arith.constant 0 : index
    %c0_0 = arith.constant 0 : index
    %0 = vector.load %arg1[%c0, %c0_0] : memref<16x32xf32, #tpu.memory_space<vmem>>, vector<16x32xf32>
    %c0_1 = arith.constant 0 : index
    %c0_2 = arith.constant 0 : index
    %1 = vector.load %arg3[%c0_1, %c0_2] : memref<1x32xf32, #tpu.memory_space<vmem>>, vector<1x32xf32>
    %c0_3 = arith.constant 0 : index
    %c0_4 = arith.constant 0 : index
    %2 = vector.load %arg4[%c0_3, %c0_4] : memref<1x32xf32, #tpu.memory_space<vmem>>, vector<1x32xf32>
    %cst = arith.constant dense<0.000000e+00> : vector<16xf32>
    %3 = vector.multi_reduction <add>, %0, %cst [1] : vector<16x32xf32> to vector<16xf32>
    %4 = vector.shape_cast %3 : vector<16xf32> to vector<16x1xf32>
    %cst_5 = arith.constant 3.200000e+01 : f32
    %5 = vector.broadcast %cst_5 : f32 to vector<16x1xf32>
    %6 = arith.divf %4, %5 : vector<16x1xf32>
    %7 = vector.broadcast %6 : vector<16x1xf32> to vector<16x32xf32>
    %8 = arith.subf %0, %7 : vector<16x32xf32>
    %9 = arith.mulf %8, %8 : vector<16x32xf32>
    %cst_6 = arith.constant dense<0.000000e+00> : vector<16xf32>
    %10 = vector.multi_reduction <add>, %9, %cst_6 [1] : vector<16x32xf32> to vector<16xf32>
    %11 = vector.shape_cast %10 : vector<16xf32> to vector<16x1xf32>
    %cst_7 = arith.constant 3.200000e+01 : f32
    %12 = vector.broadcast %cst_7 : f32 to vector<16x1xf32>
    %13 = arith.divf %11, %12 : vector<16x1xf32>
    %cst_8 = arith.constant 9.99999974E-6 : f32
    %14 = vector.broadcast %cst_8 : f32 to vector<16x1xf32>
    %15 = arith.addf %13, %14 : vector<16x1xf32>
    %16 = math.rsqrt %15 : vector<16x1xf32>
    %17 = vector.broadcast %16 : vector<16x1xf32> to vector<16x32xf32>
    %18 = arith.mulf %8, %17 : vector<16x32xf32>
    %19 = vector.broadcast %1 : vector<1x32xf32> to vector<16x32xf32>
    %20 = arith.mulf %18, %19 : vector<16x32xf32>
    %21 = vector.broadcast %2 : vector<1x32xf32> to vector<16x32xf32>
    %22 = arith.addf %20, %21 : vector<16x32xf32>
    %c0_9 = arith.constant 0 : index
    %c0_10 = arith.constant 0 : index
    %23 = vector.load %arg2[%c0_9, %c0_10] : memref<2x8xf32, #tpu.memory_space<vmem>>, vector<2x8xf32>
    %c0_11 = arith.constant 0 : index
    %c0_12 = arith.constant 0 : index
    %c0_13 = arith.constant 0 : index
    %24 = vector.load %arg5[%c0_11, %c0_12, %c0_13] : memref<2x32x96xf32, #tpu.memory_space<vmem>>, vector<1x32x96xf32>
    %25 = vector.shape_cast %24 : vector<1x32x96xf32> to vector<32x96xf32>
    %cst_14 = arith.constant dense<0.000000e+00> : vector<16x96xf32>
    %26 = tpu.matmul %22, %25, %cst_14 {dimension_numbers = #tpu.dot_dimension_numbers<[1], [0], [0], [1], [0, 0, 1, 1], [], []>} : vector<16x32xf32>, vector<32x96xf32>, vector<16x96xf32> -> vector<16x96xf32>
    %c0_15 = arith.constant 0 : index
    %c0_16 = arith.constant 0 : index
    %c0_17 = arith.constant 0 : index
    %27 = vector.load %arg6[%c0_15, %c0_16, %c0_17] : memref<2x1x96xf32, #tpu.memory_space<vmem>>, vector<1x1x96xf32>
    %28 = vector.shape_cast %27 : vector<1x1x96xf32> to vector<1x96xf32>
    %29 = vector.broadcast %28 : vector<1x96xf32> to vector<16x96xf32>
    %30 = arith.addf %26, %29 : vector<16x96xf32>
    %31 = vector.extract_strided_slice %23 {offsets = [0, 0], sizes = [1, 8], strides = [1, 1]} : vector<2x8xf32> to vector<1x8xf32>
    %32 = vector.extract_strided_slice %30 {offsets = [0, 0], sizes = [8, 8], strides = [1, 1]} : vector<16x96xf32> to vector<8x8xf32>
    %33 = vector.extract_strided_slice %30 {offsets = [0, 32], sizes = [8, 8], strides = [1, 1]} : vector<16x96xf32> to vector<8x8xf32>
    %34 = vector.extract_strided_slice %30 {offsets = [0, 64], sizes = [8, 8], strides = [1, 1]} : vector<16x96xf32> to vector<8x8xf32>
    %35 = tpu.transpose %33, [1, 0] : vector<8x8xf32> -> vector<8x8xf32>
    %cst_18 = arith.constant dense<0.000000e+00> : vector<8x8xf32>
    %36 = tpu.matmul %32, %35, %cst_18 {dimension_numbers = #tpu.dot_dimension_numbers<[1], [0], [0], [1], [0, 0, 1, 1], [], []>} : vector<8x8xf32>, vector<8x8xf32>, vector<8x8xf32> -> vector<8x8xf32>
    %cst_19 = arith.constant 0.353553385 : f32
    %37 = vector.broadcast %cst_19 : f32 to vector<8x8xf32>
    %38 = arith.mulf %36, %37 : vector<8x8xf32>
    %39 = vector.broadcast %31 : vector<1x8xf32> to vector<8x8xf32>
    %40 = arith.addf %38, %39 : vector<8x8xf32>
    %cst_20 = arith.constant dense<0xFF800000> : vector<8xf32>
    %41 = vector.multi_reduction <maximumf>, %40, %cst_20 [1] : vector<8x8xf32> to vector<8xf32>
    %42 = vector.shape_cast %41 : vector<8xf32> to vector<8x1xf32>
    %43 = vector.broadcast %42 : vector<8x1xf32> to vector<8x8xf32>
    %44 = arith.subf %40, %43 : vector<8x8xf32>
    %45 = math.exp %44 : vector<8x8xf32>
    %cst_21 = arith.constant dense<0.000000e+00> : vector<8xf32>
    %46 = vector.multi_reduction <add>, %45, %cst_21 [1] : vector<8x8xf32> to vector<8xf32>
    %47 = vector.shape_cast %46 : vector<8xf32> to vector<8x1xf32>
    %48 = tpu.reciprocal %47 {approx = true} : vector<8x1xf32> -> vector<8x1xf32>
    %49 = vector.broadcast %48 : vector<8x1xf32> to vector<8x8xf32>
    %50 = arith.mulf %45, %49 : vector<8x8xf32>
    %cst_22 = arith.constant dense<0.000000e+00> : vector<8x8xf32>
    %51 = tpu.matmul %50, %34, %cst_22 {dimension_numbers = #tpu.dot_dimension_numbers<[1], [0], [0], [1], [0, 0, 1, 1], [], []>} : vector<8x8xf32>, vector<8x8xf32>, vector<8x8xf32> -> vector<8x8xf32>
    %52 = vector.extract_strided_slice %30 {offsets = [0, 8], sizes = [8, 8], strides = [1, 1]} : vector<16x96xf32> to vector<8x8xf32>
    %53 = vector.extract_strided_slice %30 {offsets = [0, 40], sizes = [8, 8], strides = [1, 1]} : vector<16x96xf32> to vector<8x8xf32>
    %54 = vector.extract_strided_slice %30 {offsets = [0, 72], sizes = [8, 8], strides = [1, 1]} : vector<16x96xf32> to vector<8x8xf32>
    %55 = tpu.transpose %53, [1, 0] : vector<8x8xf32> -> vector<8x8xf32>
    %cst_23 = arith.constant dense<0.000000e+00> : vector<8x8xf32>
    %56 = tpu.matmul %52, %55, %cst_23 {dimension_numbers = #tpu.dot_dimension_numbers<[1], [0], [0], [1], [0, 0, 1, 1], [], []>} : vector<8x8xf32>, vector<8x8xf32>, vector<8x8xf32> -> vector<8x8xf32>
    %cst_24 = arith.constant 0.353553385 : f32
    %57 = vector.broadcast %cst_24 : f32 to vector<8x8xf32>
    %58 = arith.mulf %56, %57 : vector<8x8xf32>
    %59 = vector.broadcast %31 : vector<1x8xf32> to vector<8x8xf32>
    %60 = arith.addf %58, %59 : vector<8x8xf32>
    %cst_25 = arith.constant dense<0xFF800000> : vector<8xf32>
    %61 = vector.multi_reduction <maximumf>, %60, %cst_25 [1] : vector<8x8xf32> to vector<8xf32>
    %62 = vector.shape_cast %61 : vector<8xf32> to vector<8x1xf32>
    %63 = vector.broadcast %62 : vector<8x1xf32> to vector<8x8xf32>
    %64 = arith.subf %60, %63 : vector<8x8xf32>
    %65 = math.exp %64 : vector<8x8xf32>
    %cst_26 = arith.constant dense<0.000000e+00> : vector<8xf32>
    %66 = vector.multi_reduction <add>, %65, %cst_26 [1] : vector<8x8xf32> to vector<8xf32>
    %67 = vector.shape_cast %66 : vector<8xf32> to vector<8x1xf32>
    %68 = tpu.reciprocal %67 {approx = true} : vector<8x1xf32> -> vector<8x1xf32>
    %69 = vector.broadcast %68 : vector<8x1xf32> to vector<8x8xf32>
    %70 = arith.mulf %65, %69 : vector<8x8xf32>
    %cst_27 = arith.constant dense<0.000000e+00> : vector<8x8xf32>
    %71 = tpu.matmul %70, %54, %cst_27 {dimension_numbers = #tpu.dot_dimension_numbers<[1], [0], [0], [1], [0, 0, 1, 1], [], []>} : vector<8x8xf32>, vector<8x8xf32>, vector<8x8xf32> -> vector<8x8xf32>
    %72 = vector.extract_strided_slice %30 {offsets = [0, 16], sizes = [8, 8], strides = [1, 1]} : vector<16x96xf32> to vector<8x8xf32>
    %73 = vector.extract_strided_slice %30 {offsets = [0, 48], sizes = [8, 8], strides = [1, 1]} : vector<16x96xf32> to vector<8x8xf32>
    %74 = vector.extract_strided_slice %30 {offsets = [0, 80], sizes = [8, 8], strides = [1, 1]} : vector<16x96xf32> to vector<8x8xf32>
    %75 = tpu.transpose %73, [1, 0] : vector<8x8xf32> -> vector<8x8xf32>
    %cst_28 = arith.constant dense<0.000000e+00> : vector<8x8xf32>
    %76 = tpu.matmul %72, %75, %cst_28 {dimension_numbers = #tpu.dot_dimension_numbers<[1], [0], [0], [1], [0, 0, 1, 1], [], []>} : vector<8x8xf32>, vector<8x8xf32>, vector<8x8xf32> -> vector<8x8xf32>
    %cst_29 = arith.constant 0.353553385 : f32
    %77 = vector.broadcast %cst_29 : f32 to vector<8x8xf32>
    %78 = arith.mulf %76, %77 : vector<8x8xf32>
    %79 = vector.broadcast %31 : vector<1x8xf32> to vector<8x8xf32>
    %80 = arith.addf %78, %79 : vector<8x8xf32>
    %cst_30 = arith.constant dense<0xFF800000> : vector<8xf32>
    %81 = vector.multi_reduction <maximumf>, %80, %cst_30 [1] : vector<8x8xf32> to vector<8xf32>
    %82 = vector.shape_cast %81 : vector<8xf32> to vector<8x1xf32>
    %83 = vector.broadcast %82 : vector<8x1xf32> to vector<8x8xf32>
    %84 = arith.subf %80, %83 : vector<8x8xf32>
    %85 = math.exp %84 : vector<8x8xf32>
    %cst_31 = arith.constant dense<0.000000e+00> : vector<8xf32>
    %86 = vector.multi_reduction <add>, %85, %cst_31 [1] : vector<8x8xf32> to vector<8xf32>
    %87 = vector.shape_cast %86 : vector<8xf32> to vector<8x1xf32>
    %88 = tpu.reciprocal %87 {approx = true} : vector<8x1xf32> -> vector<8x1xf32>
    %89 = vector.broadcast %88 : vector<8x1xf32> to vector<8x8xf32>
    %90 = arith.mulf %85, %89 : vector<8x8xf32>
    %cst_32 = arith.constant dense<0.000000e+00> : vector<8x8xf32>
    %91 = tpu.matmul %90, %74, %cst_32 {dimension_numbers = #tpu.dot_dimension_numbers<[1], [0], [0], [1], [0, 0, 1, 1], [], []>} : vector<8x8xf32>, vector<8x8xf32>, vector<8x8xf32> -> vector<8x8xf32>
    %92 = vector.extract_strided_slice %30 {offsets = [0, 24], sizes = [8, 8], strides = [1, 1]} : vector<16x96xf32> to vector<8x8xf32>
    %93 = vector.extract_strided_slice %30 {offsets = [0, 56], sizes = [8, 8], strides = [1, 1]} : vector<16x96xf32> to vector<8x8xf32>
    %94 = vector.extract_strided_slice %30 {offsets = [0, 88], sizes = [8, 8], strides = [1, 1]} : vector<16x96xf32> to vector<8x8xf32>
    %95 = tpu.transpose %93, [1, 0] : vector<8x8xf32> -> vector<8x8xf32>
    %cst_33 = arith.constant dense<0.000000e+00> : vector<8x8xf32>
    %96 = tpu.matmul %92, %95, %cst_33 {dimension_numbers = #tpu.dot_dimension_numbers<[1], [0], [0], [1], [0, 0, 1, 1], [], []>} : vector<8x8xf32>, vector<8x8xf32>, vector<8x8xf32> -> vector<8x8xf32>
    %cst_34 = arith.constant 0.353553385 : f32
    %97 = vector.broadcast %cst_34 : f32 to vector<8x8xf32>
    %98 = arith.mulf %96, %97 : vector<8x8xf32>
    %99 = vector.broadcast %31 : vector<1x8xf32> to vector<8x8xf32>
    %100 = arith.addf %98, %99 : vector<8x8xf32>
    %cst_35 = arith.constant dense<0xFF800000> : vector<8xf32>
    %101 = vector.multi_reduction <maximumf>, %100, %cst_35 [1] : vector<8x8xf32> to vector<8xf32>
    %102 = vector.shape_cast %101 : vector<8xf32> to vector<8x1xf32>
    %103 = vector.broadcast %102 : vector<8x1xf32> to vector<8x8xf32>
    %104 = arith.subf %100, %103 : vector<8x8xf32>
    %105 = math.exp %104 : vector<8x8xf32>
    %cst_36 = arith.constant dense<0.000000e+00> : vector<8xf32>
    %106 = vector.multi_reduction <add>, %105, %cst_36 [1] : vector<8x8xf32> to vector<8xf32>
    %107 = vector.shape_cast %106 : vector<8xf32> to vector<8x1xf32>
    %108 = tpu.reciprocal %107 {approx = true} : vector<8x1xf32> -> vector<8x1xf32>
    %109 = vector.broadcast %108 : vector<8x1xf32> to vector<8x8xf32>
    %110 = arith.mulf %105, %109 : vector<8x8xf32>
    %cst_37 = arith.constant dense<0.000000e+00> : vector<8x8xf32>
    %111 = tpu.matmul %110, %94, %cst_37 {dimension_numbers = #tpu.dot_dimension_numbers<[1], [0], [0], [1], [0, 0, 1, 1], [], []>} : vector<8x8xf32>, vector<8x8xf32>, vector<8x8xf32> -> vector<8x8xf32>
    %112 = tpu.concatenate %51, %71, %91, %111 in 1 : vector<8x8xf32>, vector<8x8xf32>, vector<8x8xf32>, vector<8x8xf32> -> vector<8x32xf32>
    %113 = vector.extract_strided_slice %23 {offsets = [1, 0], sizes = [1, 8], strides = [1, 1]} : vector<2x8xf32> to vector<1x8xf32>
    %114 = vector.extract_strided_slice %30 {offsets = [8, 0], sizes = [8, 8], strides = [1, 1]} : vector<16x96xf32> to vector<8x8xf32>
    %115 = vector.extract_strided_slice %30 {offsets = [8, 32], sizes = [8, 8], strides = [1, 1]} : vector<16x96xf32> to vector<8x8xf32>
    %116 = vector.extract_strided_slice %30 {offsets = [8, 64], sizes = [8, 8], strides = [1, 1]} : vector<16x96xf32> to vector<8x8xf32>
    %117 = tpu.transpose %115, [1, 0] : vector<8x8xf32> -> vector<8x8xf32>
    %cst_38 = arith.constant dense<0.000000e+00> : vector<8x8xf32>
    %118 = tpu.matmul %114, %117, %cst_38 {dimension_numbers = #tpu.dot_dimension_numbers<[1], [0], [0], [1], [0, 0, 1, 1], [], []>} : vector<8x8xf32>, vector<8x8xf32>, vector<8x8xf32> -> vector<8x8xf32>
    %cst_39 = arith.constant 0.353553385 : f32
    %119 = vector.broadcast %cst_39 : f32 to vector<8x8xf32>
    %120 = arith.mulf %118, %119 : vector<8x8xf32>
    %121 = vector.broadcast %113 : vector<1x8xf32> to vector<8x8xf32>
    %122 = arith.addf %120, %121 : vector<8x8xf32>
    %cst_40 = arith.constant dense<0xFF800000> : vector<8xf32>
    %123 = vector.multi_reduction <maximumf>, %122, %cst_40 [1] : vector<8x8xf32> to vector<8xf32>
    %124 = vector.shape_cast %123 : vector<8xf32> to vector<8x1xf32>
    %125 = vector.broadcast %124 : vector<8x1xf32> to vector<8x8xf32>
    %126 = arith.subf %122, %125 : vector<8x8xf32>
    %127 = math.exp %126 : vector<8x8xf32>
    %cst_41 = arith.constant dense<0.000000e+00> : vector<8xf32>
    %128 = vector.multi_reduction <add>, %127, %cst_41 [1] : vector<8x8xf32> to vector<8xf32>
    %129 = vector.shape_cast %128 : vector<8xf32> to vector<8x1xf32>
    %130 = tpu.reciprocal %129 {approx = true} : vector<8x1xf32> -> vector<8x1xf32>
    %131 = vector.broadcast %130 : vector<8x1xf32> to vector<8x8xf32>
    %132 = arith.mulf %127, %131 : vector<8x8xf32>
    %cst_42 = arith.constant dense<0.000000e+00> : vector<8x8xf32>
    %133 = tpu.matmul %132, %116, %cst_42 {dimension_numbers = #tpu.dot_dimension_numbers<[1], [0], [0], [1], [0, 0, 1, 1], [], []>} : vector<8x8xf32>, vector<8x8xf32>, vector<8x8xf32> -> vector<8x8xf32>
    %134 = vector.extract_strided_slice %30 {offsets = [8, 8], sizes = [8, 8], strides = [1, 1]} : vector<16x96xf32> to vector<8x8xf32>
    %135 = vector.extract_strided_slice %30 {offsets = [8, 40], sizes = [8, 8], strides = [1, 1]} : vector<16x96xf32> to vector<8x8xf32>
    %136 = vector.extract_strided_slice %30 {offsets = [8, 72], sizes = [8, 8], strides = [1, 1]} : vector<16x96xf32> to vector<8x8xf32>
    %137 = tpu.transpose %135, [1, 0] : vector<8x8xf32> -> vector<8x8xf32>
    %cst_43 = arith.constant dense<0.000000e+00> : vector<8x8xf32>
    %138 = tpu.matmul %134, %137, %cst_43 {dimension_numbers = #tpu.dot_dimension_numbers<[1], [0], [0], [1], [0, 0, 1, 1], [], []>} : vector<8x8xf32>, vector<8x8xf32>, vector<8x8xf32> -> vector<8x8xf32>
    %cst_44 = arith.constant 0.353553385 : f32
    %139 = vector.broadcast %cst_44 : f32 to vector<8x8xf32>
    %140 = arith.mulf %138, %139 : vector<8x8xf32>
    %141 = vector.broadcast %113 : vector<1x8xf32> to vector<8x8xf32>
    %142 = arith.addf %140, %141 : vector<8x8xf32>
    %cst_45 = arith.constant dense<0xFF800000> : vector<8xf32>
    %143 = vector.multi_reduction <maximumf>, %142, %cst_45 [1] : vector<8x8xf32> to vector<8xf32>
    %144 = vector.shape_cast %143 : vector<8xf32> to vector<8x1xf32>
    %145 = vector.broadcast %144 : vector<8x1xf32> to vector<8x8xf32>
    %146 = arith.subf %142, %145 : vector<8x8xf32>
    %147 = math.exp %146 : vector<8x8xf32>
    %cst_46 = arith.constant dense<0.000000e+00> : vector<8xf32>
    %148 = vector.multi_reduction <add>, %147, %cst_46 [1] : vector<8x8xf32> to vector<8xf32>
    %149 = vector.shape_cast %148 : vector<8xf32> to vector<8x1xf32>
    %150 = tpu.reciprocal %149 {approx = true} : vector<8x1xf32> -> vector<8x1xf32>
    %151 = vector.broadcast %150 : vector<8x1xf32> to vector<8x8xf32>
    %152 = arith.mulf %147, %151 : vector<8x8xf32>
    %cst_47 = arith.constant dense<0.000000e+00> : vector<8x8xf32>
    %153 = tpu.matmul %152, %136, %cst_47 {dimension_numbers = #tpu.dot_dimension_numbers<[1], [0], [0], [1], [0, 0, 1, 1], [], []>} : vector<8x8xf32>, vector<8x8xf32>, vector<8x8xf32> -> vector<8x8xf32>
    %154 = vector.extract_strided_slice %30 {offsets = [8, 16], sizes = [8, 8], strides = [1, 1]} : vector<16x96xf32> to vector<8x8xf32>
    %155 = vector.extract_strided_slice %30 {offsets = [8, 48], sizes = [8, 8], strides = [1, 1]} : vector<16x96xf32> to vector<8x8xf32>
    %156 = vector.extract_strided_slice %30 {offsets = [8, 80], sizes = [8, 8], strides = [1, 1]} : vector<16x96xf32> to vector<8x8xf32>
    %157 = tpu.transpose %155, [1, 0] : vector<8x8xf32> -> vector<8x8xf32>
    %cst_48 = arith.constant dense<0.000000e+00> : vector<8x8xf32>
    %158 = tpu.matmul %154, %157, %cst_48 {dimension_numbers = #tpu.dot_dimension_numbers<[1], [0], [0], [1], [0, 0, 1, 1], [], []>} : vector<8x8xf32>, vector<8x8xf32>, vector<8x8xf32> -> vector<8x8xf32>
    %cst_49 = arith.constant 0.353553385 : f32
    %159 = vector.broadcast %cst_49 : f32 to vector<8x8xf32>
    %160 = arith.mulf %158, %159 : vector<8x8xf32>
    %161 = vector.broadcast %113 : vector<1x8xf32> to vector<8x8xf32>
    %162 = arith.addf %160, %161 : vector<8x8xf32>
    %cst_50 = arith.constant dense<0xFF800000> : vector<8xf32>
    %163 = vector.multi_reduction <maximumf>, %162, %cst_50 [1] : vector<8x8xf32> to vector<8xf32>
    %164 = vector.shape_cast %163 : vector<8xf32> to vector<8x1xf32>
    %165 = vector.broadcast %164 : vector<8x1xf32> to vector<8x8xf32>
    %166 = arith.subf %162, %165 : vector<8x8xf32>
    %167 = math.exp %166 : vector<8x8xf32>
    %cst_51 = arith.constant dense<0.000000e+00> : vector<8xf32>
    %168 = vector.multi_reduction <add>, %167, %cst_51 [1] : vector<8x8xf32> to vector<8xf32>
    %169 = vector.shape_cast %168 : vector<8xf32> to vector<8x1xf32>
    %170 = tpu.reciprocal %169 {approx = true} : vector<8x1xf32> -> vector<8x1xf32>
    %171 = vector.broadcast %170 : vector<8x1xf32> to vector<8x8xf32>
    %172 = arith.mulf %167, %171 : vector<8x8xf32>
    %cst_52 = arith.constant dense<0.000000e+00> : vector<8x8xf32>
    %173 = tpu.matmul %172, %156, %cst_52 {dimension_numbers = #tpu.dot_dimension_numbers<[1], [0], [0], [1], [0, 0, 1, 1], [], []>} : vector<8x8xf32>, vector<8x8xf32>, vector<8x8xf32> -> vector<8x8xf32>
    %174 = vector.extract_strided_slice %30 {offsets = [8, 24], sizes = [8, 8], strides = [1, 1]} : vector<16x96xf32> to vector<8x8xf32>
    %175 = vector.extract_strided_slice %30 {offsets = [8, 56], sizes = [8, 8], strides = [1, 1]} : vector<16x96xf32> to vector<8x8xf32>
    %176 = vector.extract_strided_slice %30 {offsets = [8, 88], sizes = [8, 8], strides = [1, 1]} : vector<16x96xf32> to vector<8x8xf32>
    %177 = tpu.transpose %175, [1, 0] : vector<8x8xf32> -> vector<8x8xf32>
    %cst_53 = arith.constant dense<0.000000e+00> : vector<8x8xf32>
    %178 = tpu.matmul %174, %177, %cst_53 {dimension_numbers = #tpu.dot_dimension_numbers<[1], [0], [0], [1], [0, 0, 1, 1], [], []>} : vector<8x8xf32>, vector<8x8xf32>, vector<8x8xf32> -> vector<8x8xf32>
    %cst_54 = arith.constant 0.353553385 : f32
    %179 = vector.broadcast %cst_54 : f32 to vector<8x8xf32>
    %180 = arith.mulf %178, %179 : vector<8x8xf32>
    %181 = vector.broadcast %113 : vector<1x8xf32> to vector<8x8xf32>
    %182 = arith.addf %180, %181 : vector<8x8xf32>
    %cst_55 = arith.constant dense<0xFF800000> : vector<8xf32>
    %183 = vector.multi_reduction <maximumf>, %182, %cst_55 [1] : vector<8x8xf32> to vector<8xf32>
    %184 = vector.shape_cast %183 : vector<8xf32> to vector<8x1xf32>
    %185 = vector.broadcast %184 : vector<8x1xf32> to vector<8x8xf32>
    %186 = arith.subf %182, %185 : vector<8x8xf32>
    %187 = math.exp %186 : vector<8x8xf32>
    %cst_56 = arith.constant dense<0.000000e+00> : vector<8xf32>
    %188 = vector.multi_reduction <add>, %187, %cst_56 [1] : vector<8x8xf32> to vector<8xf32>
    %189 = vector.shape_cast %188 : vector<8xf32> to vector<8x1xf32>
    %190 = tpu.reciprocal %189 {approx = true} : vector<8x1xf32> -> vector<8x1xf32>
    %191 = vector.broadcast %190 : vector<8x1xf32> to vector<8x8xf32>
    %192 = arith.mulf %187, %191 : vector<8x8xf32>
    %cst_57 = arith.constant dense<0.000000e+00> : vector<8x8xf32>
    %193 = tpu.matmul %192, %176, %cst_57 {dimension_numbers = #tpu.dot_dimension_numbers<[1], [0], [0], [1], [0, 0, 1, 1], [], []>} : vector<8x8xf32>, vector<8x8xf32>, vector<8x8xf32> -> vector<8x8xf32>
    %194 = tpu.concatenate %133, %153, %173, %193 in 1 : vector<8x8xf32>, vector<8x8xf32>, vector<8x8xf32>, vector<8x8xf32> -> vector<8x32xf32>
    %195 = tpu.concatenate %112, %194 in 0 : vector<8x32xf32>, vector<8x32xf32> -> vector<16x32xf32>
    %c0_58 = arith.constant 0 : index
    %c0_59 = arith.constant 0 : index
    %c0_60 = arith.constant 0 : index
    %196 = vector.load %arg7[%c0_58, %c0_59, %c0_60] : memref<2x32x32xf32, #tpu.memory_space<vmem>>, vector<1x32x32xf32>
    %197 = vector.shape_cast %196 : vector<1x32x32xf32> to vector<32x32xf32>
    %cst_61 = arith.constant dense<0.000000e+00> : vector<16x32xf32>
    %198 = tpu.matmul %195, %197, %cst_61 {dimension_numbers = #tpu.dot_dimension_numbers<[1], [0], [0], [1], [0, 0, 1, 1], [], []>} : vector<16x32xf32>, vector<32x32xf32>, vector<16x32xf32> -> vector<16x32xf32>
    %c0_62 = arith.constant 0 : index
    %c0_63 = arith.constant 0 : index
    %c0_64 = arith.constant 0 : index
    %199 = vector.load %arg8[%c0_62, %c0_63, %c0_64] : memref<2x1x32xf32, #tpu.memory_space<vmem>>, vector<1x1x32xf32>
    %200 = vector.shape_cast %199 : vector<1x1x32xf32> to vector<1x32xf32>
    %201 = vector.broadcast %200 : vector<1x32xf32> to vector<16x32xf32>
    %202 = arith.addf %198, %201 : vector<16x32xf32>
    %203 = arith.addf %22, %202 : vector<16x32xf32>
    %c0_65 = arith.constant 0 : index
    %c0_66 = arith.constant 0 : index
    %c0_67 = arith.constant 0 : index
    %204 = vector.load %arg9[%c0_65, %c0_66, %c0_67] : memref<2x1x32xf32, #tpu.memory_space<vmem>>, vector<1x1x32xf32>
    %205 = vector.shape_cast %204 : vector<1x1x32xf32> to vector<1x32xf32>
    %c0_68 = arith.constant 0 : index
    %c0_69 = arith.constant 0 : index
    %c0_70 = arith.constant 0 : index
    %206 = vector.load %arg10[%c0_68, %c0_69, %c0_70] : memref<2x1x32xf32, #tpu.memory_space<vmem>>, vector<1x1x32xf32>
    %207 = vector.shape_cast %206 : vector<1x1x32xf32> to vector<1x32xf32>
    %cst_71 = arith.constant dense<0.000000e+00> : vector<16xf32>
    %208 = vector.multi_reduction <add>, %203, %cst_71 [1] : vector<16x32xf32> to vector<16xf32>
    %209 = vector.shape_cast %208 : vector<16xf32> to vector<16x1xf32>
    %cst_72 = arith.constant 3.200000e+01 : f32
    %210 = vector.broadcast %cst_72 : f32 to vector<16x1xf32>
    %211 = arith.divf %209, %210 : vector<16x1xf32>
    %212 = vector.broadcast %211 : vector<16x1xf32> to vector<16x32xf32>
    %213 = arith.subf %203, %212 : vector<16x32xf32>
    %214 = arith.mulf %213, %213 : vector<16x32xf32>
    %cst_73 = arith.constant dense<0.000000e+00> : vector<16xf32>
    %215 = vector.multi_reduction <add>, %214, %cst_73 [1] : vector<16x32xf32> to vector<16xf32>
    %216 = vector.shape_cast %215 : vector<16xf32> to vector<16x1xf32>
    %cst_74 = arith.constant 3.200000e+01 : f32
    %217 = vector.broadcast %cst_74 : f32 to vector<16x1xf32>
    %218 = arith.divf %216, %217 : vector<16x1xf32>
    %cst_75 = arith.constant 9.99999974E-6 : f32
    %219 = vector.broadcast %cst_75 : f32 to vector<16x1xf32>
    %220 = arith.addf %218, %219 : vector<16x1xf32>
    %221 = math.rsqrt %220 : vector<16x1xf32>
    %222 = vector.broadcast %221 : vector<16x1xf32> to vector<16x32xf32>
    %223 = arith.mulf %213, %222 : vector<16x32xf32>
    %224 = vector.broadcast %205 : vector<1x32xf32> to vector<16x32xf32>
    %225 = arith.mulf %223, %224 : vector<16x32xf32>
    %226 = vector.broadcast %207 : vector<1x32xf32> to vector<16x32xf32>
    %227 = arith.addf %225, %226 : vector<16x32xf32>
    %c0_76 = arith.constant 0 : index
    %c0_77 = arith.constant 0 : index
    %c0_78 = arith.constant 0 : index
    %228 = vector.load %arg11[%c0_76, %c0_77, %c0_78] : memref<2x32x64xf32, #tpu.memory_space<vmem>>, vector<1x32x64xf32>
    %229 = vector.shape_cast %228 : vector<1x32x64xf32> to vector<32x64xf32>
    %cst_79 = arith.constant dense<0.000000e+00> : vector<16x64xf32>
    %230 = tpu.matmul %227, %229, %cst_79 {dimension_numbers = #tpu.dot_dimension_numbers<[1], [0], [0], [1], [0, 0, 1, 1], [], []>} : vector<16x32xf32>, vector<32x64xf32>, vector<16x64xf32> -> vector<16x64xf32>
    %c0_80 = arith.constant 0 : index
    %c0_81 = arith.constant 0 : index
    %c0_82 = arith.constant 0 : index
    %231 = vector.load %arg12[%c0_80, %c0_81, %c0_82] : memref<2x1x64xf32, #tpu.memory_space<vmem>>, vector<1x1x64xf32>
    %232 = vector.shape_cast %231 : vector<1x1x64xf32> to vector<1x64xf32>
    %233 = vector.broadcast %232 : vector<1x64xf32> to vector<16x64xf32>
    %234 = arith.addf %230, %233 : vector<16x64xf32>
    %cst_83 = arith.constant 5.000000e-01 : f32
    %235 = vector.broadcast %cst_83 : f32 to vector<16x64xf32>
    %236 = arith.mulf %235, %234 : vector<16x64xf32>
    %cst_84 = arith.constant 0.707106769 : f32
    %237 = vector.broadcast %cst_84 : f32 to vector<16x64xf32>
    %238 = arith.mulf %234, %237 : vector<16x64xf32>
    %239 = math.erf %238 : vector<16x64xf32>
    %cst_85 = arith.constant 1.000000e+00 : f32
    %240 = vector.broadcast %cst_85 : f32 to vector<16x64xf32>
    %241 = arith.addf %240, %239 : vector<16x64xf32>
    %242 = arith.mulf %236, %241 : vector<16x64xf32>
    %c0_86 = arith.constant 0 : index
    %c0_87 = arith.constant 0 : index
    %c0_88 = arith.constant 0 : index
    %243 = vector.load %arg13[%c0_86, %c0_87, %c0_88] : memref<2x64x32xf32, #tpu.memory_space<vmem>>, vector<1x64x32xf32>
    %244 = vector.shape_cast %243 : vector<1x64x32xf32> to vector<64x32xf32>
    %cst_89 = arith.constant dense<0.000000e+00> : vector<16x32xf32>
    %245 = tpu.matmul %242, %244, %cst_89 {dimension_numbers = #tpu.dot_dimension_numbers<[1], [0], [0], [1], [0, 0, 1, 1], [], []>} : vector<16x64xf32>, vector<64x32xf32>, vector<16x32xf32> -> vector<16x32xf32>
    %c0_90 = arith.constant 0 : index
    %c0_91 = arith.constant 0 : index
    %c0_92 = arith.constant 0 : index
    %246 = vector.load %arg14[%c0_90, %c0_91, %c0_92] : memref<2x1x32xf32, #tpu.memory_space<vmem>>, vector<1x1x32xf32>
    %247 = vector.shape_cast %246 : vector<1x1x32xf32> to vector<1x32xf32>
    %248 = vector.broadcast %247 : vector<1x32xf32> to vector<16x32xf32>
    %249 = arith.addf %245, %248 : vector<16x32xf32>
    %250 = arith.addf %227, %249 : vector<16x32xf32>
    %c0_93 = arith.constant 0 : index
    %c0_94 = arith.constant 0 : index
    %c0_95 = arith.constant 0 : index
    %251 = vector.load %arg15[%c0_93, %c0_94, %c0_95] : memref<2x1x32xf32, #tpu.memory_space<vmem>>, vector<1x1x32xf32>
    %252 = vector.shape_cast %251 : vector<1x1x32xf32> to vector<1x32xf32>
    %c0_96 = arith.constant 0 : index
    %c0_97 = arith.constant 0 : index
    %c0_98 = arith.constant 0 : index
    %253 = vector.load %arg16[%c0_96, %c0_97, %c0_98] : memref<2x1x32xf32, #tpu.memory_space<vmem>>, vector<1x1x32xf32>
    %254 = vector.shape_cast %253 : vector<1x1x32xf32> to vector<1x32xf32>
    %cst_99 = arith.constant dense<0.000000e+00> : vector<16xf32>
    %255 = vector.multi_reduction <add>, %250, %cst_99 [1] : vector<16x32xf32> to vector<16xf32>
    %256 = vector.shape_cast %255 : vector<16xf32> to vector<16x1xf32>
    %cst_100 = arith.constant 3.200000e+01 : f32
    %257 = vector.broadcast %cst_100 : f32 to vector<16x1xf32>
    %258 = arith.divf %256, %257 : vector<16x1xf32>
    %259 = vector.broadcast %258 : vector<16x1xf32> to vector<16x32xf32>
    %260 = arith.subf %250, %259 : vector<16x32xf32>
    %261 = arith.mulf %260, %260 : vector<16x32xf32>
    %cst_101 = arith.constant dense<0.000000e+00> : vector<16xf32>
    %262 = vector.multi_reduction <add>, %261, %cst_101 [1] : vector<16x32xf32> to vector<16xf32>
    %263 = vector.shape_cast %262 : vector<16xf32> to vector<16x1xf32>
    %cst_102 = arith.constant 3.200000e+01 : f32
    %264 = vector.broadcast %cst_102 : f32 to vector<16x1xf32>
    %265 = arith.divf %263, %264 : vector<16x1xf32>
    %cst_103 = arith.constant 9.99999974E-6 : f32
    %266 = vector.broadcast %cst_103 : f32 to vector<16x1xf32>
    %267 = arith.addf %265, %266 : vector<16x1xf32>
    %268 = math.rsqrt %267 : vector<16x1xf32>
    %269 = vector.broadcast %268 : vector<16x1xf32> to vector<16x32xf32>
    %270 = arith.mulf %260, %269 : vector<16x32xf32>
    %271 = vector.broadcast %252 : vector<1x32xf32> to vector<16x32xf32>
    %272 = arith.mulf %270, %271 : vector<16x32xf32>
    %273 = vector.broadcast %254 : vector<1x32xf32> to vector<16x32xf32>
    %274 = arith.addf %272, %273 : vector<16x32xf32>
    %c1 = arith.constant 1 : index
    %c0_104 = arith.constant 0 : index
    %c0_105 = arith.constant 0 : index
    %275 = vector.load %arg5[%c1, %c0_104, %c0_105] : memref<2x32x96xf32, #tpu.memory_space<vmem>>, vector<1x32x96xf32>
    %276 = vector.shape_cast %275 : vector<1x32x96xf32> to vector<32x96xf32>
    %cst_106 = arith.constant dense<0.000000e+00> : vector<16x96xf32>
    %277 = tpu.matmul %274, %276, %cst_106 {dimension_numbers = #tpu.dot_dimension_numbers<[1], [0], [0], [1], [0, 0, 1, 1], [], []>} : vector<16x32xf32>, vector<32x96xf32>, vector<16x96xf32> -> vector<16x96xf32>
    %c1_107 = arith.constant 1 : index
    %c0_108 = arith.constant 0 : index
    %c0_109 = arith.constant 0 : index
    %278 = vector.load %arg6[%c1_107, %c0_108, %c0_109] : memref<2x1x96xf32, #tpu.memory_space<vmem>>, vector<1x1x96xf32>
    %279 = vector.shape_cast %278 : vector<1x1x96xf32> to vector<1x96xf32>
    %280 = vector.broadcast %279 : vector<1x96xf32> to vector<16x96xf32>
    %281 = arith.addf %277, %280 : vector<16x96xf32>
    %282 = vector.extract_strided_slice %23 {offsets = [0, 0], sizes = [1, 8], strides = [1, 1]} : vector<2x8xf32> to vector<1x8xf32>
    %283 = vector.extract_strided_slice %281 {offsets = [0, 0], sizes = [8, 8], strides = [1, 1]} : vector<16x96xf32> to vector<8x8xf32>
    %284 = vector.extract_strided_slice %281 {offsets = [0, 32], sizes = [8, 8], strides = [1, 1]} : vector<16x96xf32> to vector<8x8xf32>
    %285 = vector.extract_strided_slice %281 {offsets = [0, 64], sizes = [8, 8], strides = [1, 1]} : vector<16x96xf32> to vector<8x8xf32>
    %286 = tpu.transpose %284, [1, 0] : vector<8x8xf32> -> vector<8x8xf32>
    %cst_110 = arith.constant dense<0.000000e+00> : vector<8x8xf32>
    %287 = tpu.matmul %283, %286, %cst_110 {dimension_numbers = #tpu.dot_dimension_numbers<[1], [0], [0], [1], [0, 0, 1, 1], [], []>} : vector<8x8xf32>, vector<8x8xf32>, vector<8x8xf32> -> vector<8x8xf32>
    %cst_111 = arith.constant 0.353553385 : f32
    %288 = vector.broadcast %cst_111 : f32 to vector<8x8xf32>
    %289 = arith.mulf %287, %288 : vector<8x8xf32>
    %290 = vector.broadcast %282 : vector<1x8xf32> to vector<8x8xf32>
    %291 = arith.addf %289, %290 : vector<8x8xf32>
    %cst_112 = arith.constant dense<0xFF800000> : vector<8xf32>
    %292 = vector.multi_reduction <maximumf>, %291, %cst_112 [1] : vector<8x8xf32> to vector<8xf32>
    %293 = vector.shape_cast %292 : vector<8xf32> to vector<8x1xf32>
    %294 = vector.broadcast %293 : vector<8x1xf32> to vector<8x8xf32>
    %295 = arith.subf %291, %294 : vector<8x8xf32>
    %296 = math.exp %295 : vector<8x8xf32>
    %cst_113 = arith.constant dense<0.000000e+00> : vector<8xf32>
    %297 = vector.multi_reduction <add>, %296, %cst_113 [1] : vector<8x8xf32> to vector<8xf32>
    %298 = vector.shape_cast %297 : vector<8xf32> to vector<8x1xf32>
    %299 = tpu.reciprocal %298 {approx = true} : vector<8x1xf32> -> vector<8x1xf32>
    %300 = vector.broadcast %299 : vector<8x1xf32> to vector<8x8xf32>
    %301 = arith.mulf %296, %300 : vector<8x8xf32>
    %cst_114 = arith.constant dense<0.000000e+00> : vector<8x8xf32>
    %302 = tpu.matmul %301, %285, %cst_114 {dimension_numbers = #tpu.dot_dimension_numbers<[1], [0], [0], [1], [0, 0, 1, 1], [], []>} : vector<8x8xf32>, vector<8x8xf32>, vector<8x8xf32> -> vector<8x8xf32>
    %303 = vector.extract_strided_slice %281 {offsets = [0, 8], sizes = [8, 8], strides = [1, 1]} : vector<16x96xf32> to vector<8x8xf32>
    %304 = vector.extract_strided_slice %281 {offsets = [0, 40], sizes = [8, 8], strides = [1, 1]} : vector<16x96xf32> to vector<8x8xf32>
    %305 = vector.extract_strided_slice %281 {offsets = [0, 72], sizes = [8, 8], strides = [1, 1]} : vector<16x96xf32> to vector<8x8xf32>
    %306 = tpu.transpose %304, [1, 0] : vector<8x8xf32> -> vector<8x8xf32>
    %cst_115 = arith.constant dense<0.000000e+00> : vector<8x8xf32>
    %307 = tpu.matmul %303, %306, %cst_115 {dimension_numbers = #tpu.dot_dimension_numbers<[1], [0], [0], [1], [0, 0, 1, 1], [], []>} : vector<8x8xf32>, vector<8x8xf32>, vector<8x8xf32> -> vector<8x8xf32>
    %cst_116 = arith.constant 0.353553385 : f32
    %308 = vector.broadcast %cst_116 : f32 to vector<8x8xf32>
    %309 = arith.mulf %307, %308 : vector<8x8xf32>
    %310 = vector.broadcast %282 : vector<1x8xf32> to vector<8x8xf32>
    %311 = arith.addf %309, %310 : vector<8x8xf32>
    %cst_117 = arith.constant dense<0xFF800000> : vector<8xf32>
    %312 = vector.multi_reduction <maximumf>, %311, %cst_117 [1] : vector<8x8xf32> to vector<8xf32>
    %313 = vector.shape_cast %312 : vector<8xf32> to vector<8x1xf32>
    %314 = vector.broadcast %313 : vector<8x1xf32> to vector<8x8xf32>
    %315 = arith.subf %311, %314 : vector<8x8xf32>
    %316 = math.exp %315 : vector<8x8xf32>
    %cst_118 = arith.constant dense<0.000000e+00> : vector<8xf32>
    %317 = vector.multi_reduction <add>, %316, %cst_118 [1] : vector<8x8xf32> to vector<8xf32>
    %318 = vector.shape_cast %317 : vector<8xf32> to vector<8x1xf32>
    %319 = tpu.reciprocal %318 {approx = true} : vector<8x1xf32> -> vector<8x1xf32>
    %320 = vector.broadcast %319 : vector<8x1xf32> to vector<8x8xf32>
    %321 = arith.mulf %316, %320 : vector<8x8xf32>
    %cst_119 = arith.constant dense<0.000000e+00> : vector<8x8xf32>
    %322 = tpu.matmul %321, %305, %cst_119 {dimension_numbers = #tpu.dot_dimension_numbers<[1], [0], [0], [1], [0, 0, 1, 1], [], []>} : vector<8x8xf32>, vector<8x8xf32>, vector<8x8xf32> -> vector<8x8xf32>
    %323 = vector.extract_strided_slice %281 {offsets = [0, 16], sizes = [8, 8], strides = [1, 1]} : vector<16x96xf32> to vector<8x8xf32>
    %324 = vector.extract_strided_slice %281 {offsets = [0, 48], sizes = [8, 8], strides = [1, 1]} : vector<16x96xf32> to vector<8x8xf32>
    %325 = vector.extract_strided_slice %281 {offsets = [0, 80], sizes = [8, 8], strides = [1, 1]} : vector<16x96xf32> to vector<8x8xf32>
    %326 = tpu.transpose %324, [1, 0] : vector<8x8xf32> -> vector<8x8xf32>
    %cst_120 = arith.constant dense<0.000000e+00> : vector<8x8xf32>
    %327 = tpu.matmul %323, %326, %cst_120 {dimension_numbers = #tpu.dot_dimension_numbers<[1], [0], [0], [1], [0, 0, 1, 1], [], []>} : vector<8x8xf32>, vector<8x8xf32>, vector<8x8xf32> -> vector<8x8xf32>
    %cst_121 = arith.constant 0.353553385 : f32
    %328 = vector.broadcast %cst_121 : f32 to vector<8x8xf32>
    %329 = arith.mulf %327, %328 : vector<8x8xf32>
    %330 = vector.broadcast %282 : vector<1x8xf32> to vector<8x8xf32>
    %331 = arith.addf %329, %330 : vector<8x8xf32>
    %cst_122 = arith.constant dense<0xFF800000> : vector<8xf32>
    %332 = vector.multi_reduction <maximumf>, %331, %cst_122 [1] : vector<8x8xf32> to vector<8xf32>
    %333 = vector.shape_cast %332 : vector<8xf32> to vector<8x1xf32>
    %334 = vector.broadcast %333 : vector<8x1xf32> to vector<8x8xf32>
    %335 = arith.subf %331, %334 : vector<8x8xf32>
    %336 = math.exp %335 : vector<8x8xf32>
    %cst_123 = arith.constant dense<0.000000e+00> : vector<8xf32>
    %337 = vector.multi_reduction <add>, %336, %cst_123 [1] : vector<8x8xf32> to vector<8xf32>
    %338 = vector.shape_cast %337 : vector<8xf32> to vector<8x1xf32>
    %339 = tpu.reciprocal %338 {approx = true} : vector<8x1xf32> -> vector<8x1xf32>
    %340 = vector.broadcast %339 : vector<8x1xf32> to vector<8x8xf32>
    %341 = arith.mulf %336, %340 : vector<8x8xf32>
    %cst_124 = arith.constant dense<0.000000e+00> : vector<8x8xf32>
    %342 = tpu.matmul %341, %325, %cst_124 {dimension_numbers = #tpu.dot_dimension_numbers<[1], [0], [0], [1], [0, 0, 1, 1], [], []>} : vector<8x8xf32>, vector<8x8xf32>, vector<8x8xf32> -> vector<8x8xf32>
    %343 = vector.extract_strided_slice %281 {offsets = [0, 24], sizes = [8, 8], strides = [1, 1]} : vector<16x96xf32> to vector<8x8xf32>
    %344 = vector.extract_strided_slice %281 {offsets = [0, 56], sizes = [8, 8], strides = [1, 1]} : vector<16x96xf32> to vector<8x8xf32>
    %345 = vector.extract_strided_slice %281 {offsets = [0, 88], sizes = [8, 8], strides = [1, 1]} : vector<16x96xf32> to vector<8x8xf32>
    %346 = tpu.transpose %344, [1, 0] : vector<8x8xf32> -> vector<8x8xf32>
    %cst_125 = arith.constant dense<0.000000e+00> : vector<8x8xf32>
    %347 = tpu.matmul %343, %346, %cst_125 {dimension_numbers = #tpu.dot_dimension_numbers<[1], [0], [0], [1], [0, 0, 1, 1], [], []>} : vector<8x8xf32>, vector<8x8xf32>, vector<8x8xf32> -> vector<8x8xf32>
    %cst_126 = arith.constant 0.353553385 : f32
    %348 = vector.broadcast %cst_126 : f32 to vector<8x8xf32>
    %349 = arith.mulf %347, %348 : vector<8x8xf32>
    %350 = vector.broadcast %282 : vector<1x8xf32> to vector<8x8xf32>
    %351 = arith.addf %349, %350 : vector<8x8xf32>
    %cst_127 = arith.constant dense<0xFF800000> : vector<8xf32>
    %352 = vector.multi_reduction <maximumf>, %351, %cst_127 [1] : vector<8x8xf32> to vector<8xf32>
    %353 = vector.shape_cast %352 : vector<8xf32> to vector<8x1xf32>
    %354 = vector.broadcast %353 : vector<8x1xf32> to vector<8x8xf32>
    %355 = arith.subf %351, %354 : vector<8x8xf32>
    %356 = math.exp %355 : vector<8x8xf32>
    %cst_128 = arith.constant dense<0.000000e+00> : vector<8xf32>
    %357 = vector.multi_reduction <add>, %356, %cst_128 [1] : vector<8x8xf32> to vector<8xf32>
    %358 = vector.shape_cast %357 : vector<8xf32> to vector<8x1xf32>
    %359 = tpu.reciprocal %358 {approx = true} : vector<8x1xf32> -> vector<8x1xf32>
    %360 = vector.broadcast %359 : vector<8x1xf32> to vector<8x8xf32>
    %361 = arith.mulf %356, %360 : vector<8x8xf32>
    %cst_129 = arith.constant dense<0.000000e+00> : vector<8x8xf32>
    %362 = tpu.matmul %361, %345, %cst_129 {dimension_numbers = #tpu.dot_dimension_numbers<[1], [0], [0], [1], [0, 0, 1, 1], [], []>} : vector<8x8xf32>, vector<8x8xf32>, vector<8x8xf32> -> vector<8x8xf32>
    %363 = tpu.concatenate %302, %322, %342, %362 in 1 : vector<8x8xf32>, vector<8x8xf32>, vector<8x8xf32>, vector<8x8xf32> -> vector<8x32xf32>
    %364 = vector.extract_strided_slice %23 {offsets = [1, 0], sizes = [1, 8], strides = [1, 1]} : vector<2x8xf32> to vector<1x8xf32>
    %365 = vector.extract_strided_slice %281 {offsets = [8, 0], sizes = [8, 8], strides = [1, 1]} : vector<16x96xf32> to vector<8x8xf32>
    %366 = vector.extract_strided_slice %281 {offsets = [8, 32], sizes = [8, 8], strides = [1, 1]} : vector<16x96xf32> to vector<8x8xf32>
    %367 = vector.extract_strided_slice %281 {offsets = [8, 64], sizes = [8, 8], strides = [1, 1]} : vector<16x96xf32> to vector<8x8xf32>
    %368 = tpu.transpose %366, [1, 0] : vector<8x8xf32> -> vector<8x8xf32>
    %cst_130 = arith.constant dense<0.000000e+00> : vector<8x8xf32>
    %369 = tpu.matmul %365, %368, %cst_130 {dimension_numbers = #tpu.dot_dimension_numbers<[1], [0], [0], [1], [0, 0, 1, 1], [], []>} : vector<8x8xf32>, vector<8x8xf32>, vector<8x8xf32> -> vector<8x8xf32>
    %cst_131 = arith.constant 0.353553385 : f32
    %370 = vector.broadcast %cst_131 : f32 to vector<8x8xf32>
    %371 = arith.mulf %369, %370 : vector<8x8xf32>
    %372 = vector.broadcast %364 : vector<1x8xf32> to vector<8x8xf32>
    %373 = arith.addf %371, %372 : vector<8x8xf32>
    %cst_132 = arith.constant dense<0xFF800000> : vector<8xf32>
    %374 = vector.multi_reduction <maximumf>, %373, %cst_132 [1] : vector<8x8xf32> to vector<8xf32>
    %375 = vector.shape_cast %374 : vector<8xf32> to vector<8x1xf32>
    %376 = vector.broadcast %375 : vector<8x1xf32> to vector<8x8xf32>
    %377 = arith.subf %373, %376 : vector<8x8xf32>
    %378 = math.exp %377 : vector<8x8xf32>
    %cst_133 = arith.constant dense<0.000000e+00> : vector<8xf32>
    %379 = vector.multi_reduction <add>, %378, %cst_133 [1] : vector<8x8xf32> to vector<8xf32>
    %380 = vector.shape_cast %379 : vector<8xf32> to vector<8x1xf32>
    %381 = tpu.reciprocal %380 {approx = true} : vector<8x1xf32> -> vector<8x1xf32>
    %382 = vector.broadcast %381 : vector<8x1xf32> to vector<8x8xf32>
    %383 = arith.mulf %378, %382 : vector<8x8xf32>
    %cst_134 = arith.constant dense<0.000000e+00> : vector<8x8xf32>
    %384 = tpu.matmul %383, %367, %cst_134 {dimension_numbers = #tpu.dot_dimension_numbers<[1], [0], [0], [1], [0, 0, 1, 1], [], []>} : vector<8x8xf32>, vector<8x8xf32>, vector<8x8xf32> -> vector<8x8xf32>
    %385 = vector.extract_strided_slice %281 {offsets = [8, 8], sizes = [8, 8], strides = [1, 1]} : vector<16x96xf32> to vector<8x8xf32>
    %386 = vector.extract_strided_slice %281 {offsets = [8, 40], sizes = [8, 8], strides = [1, 1]} : vector<16x96xf32> to vector<8x8xf32>
    %387 = vector.extract_strided_slice %281 {offsets = [8, 72], sizes = [8, 8], strides = [1, 1]} : vector<16x96xf32> to vector<8x8xf32>
    %388 = tpu.transpose %386, [1, 0] : vector<8x8xf32> -> vector<8x8xf32>
    %cst_135 = arith.constant dense<0.000000e+00> : vector<8x8xf32>
    %389 = tpu.matmul %385, %388, %cst_135 {dimension_numbers = #tpu.dot_dimension_numbers<[1], [0], [0], [1], [0, 0, 1, 1], [], []>} : vector<8x8xf32>, vector<8x8xf32>, vector<8x8xf32> -> vector<8x8xf32>
    %cst_136 = arith.constant 0.353553385 : f32
    %390 = vector.broadcast %cst_136 : f32 to vector<8x8xf32>
    %391 = arith.mulf %389, %390 : vector<8x8xf32>
    %392 = vector.broadcast %364 : vector<1x8xf32> to vector<8x8xf32>
    %393 = arith.addf %391, %392 : vector<8x8xf32>
    %cst_137 = arith.constant dense<0xFF800000> : vector<8xf32>
    %394 = vector.multi_reduction <maximumf>, %393, %cst_137 [1] : vector<8x8xf32> to vector<8xf32>
    %395 = vector.shape_cast %394 : vector<8xf32> to vector<8x1xf32>
    %396 = vector.broadcast %395 : vector<8x1xf32> to vector<8x8xf32>
    %397 = arith.subf %393, %396 : vector<8x8xf32>
    %398 = math.exp %397 : vector<8x8xf32>
    %cst_138 = arith.constant dense<0.000000e+00> : vector<8xf32>
    %399 = vector.multi_reduction <add>, %398, %cst_138 [1] : vector<8x8xf32> to vector<8xf32>
    %400 = vector.shape_cast %399 : vector<8xf32> to vector<8x1xf32>
    %401 = tpu.reciprocal %400 {approx = true} : vector<8x1xf32> -> vector<8x1xf32>
    %402 = vector.broadcast %401 : vector<8x1xf32> to vector<8x8xf32>
    %403 = arith.mulf %398, %402 : vector<8x8xf32>
    %cst_139 = arith.constant dense<0.000000e+00> : vector<8x8xf32>
    %404 = tpu.matmul %403, %387, %cst_139 {dimension_numbers = #tpu.dot_dimension_numbers<[1], [0], [0], [1], [0, 0, 1, 1], [], []>} : vector<8x8xf32>, vector<8x8xf32>, vector<8x8xf32> -> vector<8x8xf32>
    %405 = vector.extract_strided_slice %281 {offsets = [8, 16], sizes = [8, 8], strides = [1, 1]} : vector<16x96xf32> to vector<8x8xf32>
    %406 = vector.extract_strided_slice %281 {offsets = [8, 48], sizes = [8, 8], strides = [1, 1]} : vector<16x96xf32> to vector<8x8xf32>
    %407 = vector.extract_strided_slice %281 {offsets = [8, 80], sizes = [8, 8], strides = [1, 1]} : vector<16x96xf32> to vector<8x8xf32>
    %408 = tpu.transpose %406, [1, 0] : vector<8x8xf32> -> vector<8x8xf32>
    %cst_140 = arith.constant dense<0.000000e+00> : vector<8x8xf32>
    %409 = tpu.matmul %405, %408, %cst_140 {dimension_numbers = #tpu.dot_dimension_numbers<[1], [0], [0], [1], [0, 0, 1, 1], [], []>} : vector<8x8xf32>, vector<8x8xf32>, vector<8x8xf32> -> vector<8x8xf32>
    %cst_141 = arith.constant 0.353553385 : f32
    %410 = vector.broadcast %cst_141 : f32 to vector<8x8xf32>
    %411 = arith.mulf %409, %410 : vector<8x8xf32>
    %412 = vector.broadcast %364 : vector<1x8xf32> to vector<8x8xf32>
    %413 = arith.addf %411, %412 : vector<8x8xf32>
    %cst_142 = arith.constant dense<0xFF800000> : vector<8xf32>
    %414 = vector.multi_reduction <maximumf>, %413, %cst_142 [1] : vector<8x8xf32> to vector<8xf32>
    %415 = vector.shape_cast %414 : vector<8xf32> to vector<8x1xf32>
    %416 = vector.broadcast %415 : vector<8x1xf32> to vector<8x8xf32>
    %417 = arith.subf %413, %416 : vector<8x8xf32>
    %418 = math.exp %417 : vector<8x8xf32>
    %cst_143 = arith.constant dense<0.000000e+00> : vector<8xf32>
    %419 = vector.multi_reduction <add>, %418, %cst_143 [1] : vector<8x8xf32> to vector<8xf32>
    %420 = vector.shape_cast %419 : vector<8xf32> to vector<8x1xf32>
    %421 = tpu.reciprocal %420 {approx = true} : vector<8x1xf32> -> vector<8x1xf32>
    %422 = vector.broadcast %421 : vector<8x1xf32> to vector<8x8xf32>
    %423 = arith.mulf %418, %422 : vector<8x8xf32>
    %cst_144 = arith.constant dense<0.000000e+00> : vector<8x8xf32>
    %424 = tpu.matmul %423, %407, %cst_144 {dimension_numbers = #tpu.dot_dimension_numbers<[1], [0], [0], [1], [0, 0, 1, 1], [], []>} : vector<8x8xf32>, vector<8x8xf32>, vector<8x8xf32> -> vector<8x8xf32>
    %425 = vector.extract_strided_slice %281 {offsets = [8, 24], sizes = [8, 8], strides = [1, 1]} : vector<16x96xf32> to vector<8x8xf32>
    %426 = vector.extract_strided_slice %281 {offsets = [8, 56], sizes = [8, 8], strides = [1, 1]} : vector<16x96xf32> to vector<8x8xf32>
    %427 = vector.extract_strided_slice %281 {offsets = [8, 88], sizes = [8, 8], strides = [1, 1]} : vector<16x96xf32> to vector<8x8xf32>
    %428 = tpu.transpose %426, [1, 0] : vector<8x8xf32> -> vector<8x8xf32>
    %cst_145 = arith.constant dense<0.000000e+00> : vector<8x8xf32>
    %429 = tpu.matmul %425, %428, %cst_145 {dimension_numbers = #tpu.dot_dimension_numbers<[1], [0], [0], [1], [0, 0, 1, 1], [], []>} : vector<8x8xf32>, vector<8x8xf32>, vector<8x8xf32> -> vector<8x8xf32>
    %cst_146 = arith.constant 0.353553385 : f32
    %430 = vector.broadcast %cst_146 : f32 to vector<8x8xf32>
    %431 = arith.mulf %429, %430 : vector<8x8xf32>
    %432 = vector.broadcast %364 : vector<1x8xf32> to vector<8x8xf32>
    %433 = arith.addf %431, %432 : vector<8x8xf32>
    %cst_147 = arith.constant dense<0xFF800000> : vector<8xf32>
    %434 = vector.multi_reduction <maximumf>, %433, %cst_147 [1] : vector<8x8xf32> to vector<8xf32>
    %435 = vector.shape_cast %434 : vector<8xf32> to vector<8x1xf32>
    %436 = vector.broadcast %435 : vector<8x1xf32> to vector<8x8xf32>
    %437 = arith.subf %433, %436 : vector<8x8xf32>
    %438 = math.exp %437 : vector<8x8xf32>
    %cst_148 = arith.constant dense<0.000000e+00> : vector<8xf32>
    %439 = vector.multi_reduction <add>, %438, %cst_148 [1] : vector<8x8xf32> to vector<8xf32>
    %440 = vector.shape_cast %439 : vector<8xf32> to vector<8x1xf32>
    %441 = tpu.reciprocal %440 {approx = true} : vector<8x1xf32> -> vector<8x1xf32>
    %442 = vector.broadcast %441 : vector<8x1xf32> to vector<8x8xf32>
    %443 = arith.mulf %438, %442 : vector<8x8xf32>
    %cst_149 = arith.constant dense<0.000000e+00> : vector<8x8xf32>
    %444 = tpu.matmul %443, %427, %cst_149 {dimension_numbers = #tpu.dot_dimension_numbers<[1], [0], [0], [1], [0, 0, 1, 1], [], []>} : vector<8x8xf32>, vector<8x8xf32>, vector<8x8xf32> -> vector<8x8xf32>
    %445 = tpu.concatenate %384, %404, %424, %444 in 1 : vector<8x8xf32>, vector<8x8xf32>, vector<8x8xf32>, vector<8x8xf32> -> vector<8x32xf32>
    %446 = tpu.concatenate %363, %445 in 0 : vector<8x32xf32>, vector<8x32xf32> -> vector<16x32xf32>
    %c1_150 = arith.constant 1 : index
    %c0_151 = arith.constant 0 : index
    %c0_152 = arith.constant 0 : index
    %447 = vector.load %arg7[%c1_150, %c0_151, %c0_152] : memref<2x32x32xf32, #tpu.memory_space<vmem>>, vector<1x32x32xf32>
    %448 = vector.shape_cast %447 : vector<1x32x32xf32> to vector<32x32xf32>
    %cst_153 = arith.constant dense<0.000000e+00> : vector<16x32xf32>
    %449 = tpu.matmul %446, %448, %cst_153 {dimension_numbers = #tpu.dot_dimension_numbers<[1], [0], [0], [1], [0, 0, 1, 1], [], []>} : vector<16x32xf32>, vector<32x32xf32>, vector<16x32xf32> -> vector<16x32xf32>
    %c1_154 = arith.constant 1 : index
    %c0_155 = arith.constant 0 : index
    %c0_156 = arith.constant 0 : index
    %450 = vector.load %arg8[%c1_154, %c0_155, %c0_156] : memref<2x1x32xf32, #tpu.memory_space<vmem>>, vector<1x1x32xf32>
    %451 = vector.shape_cast %450 : vector<1x1x32xf32> to vector<1x32xf32>
    %452 = vector.broadcast %451 : vector<1x32xf32> to vector<16x32xf32>
    %453 = arith.addf %449, %452 : vector<16x32xf32>
    %454 = arith.addf %274, %453 : vector<16x32xf32>
    %c1_157 = arith.constant 1 : index
    %c0_158 = arith.constant 0 : index
    %c0_159 = arith.constant 0 : index
    %455 = vector.load %arg9[%c1_157, %c0_158, %c0_159] : memref<2x1x32xf32, #tpu.memory_space<vmem>>, vector<1x1x32xf32>
    %456 = vector.shape_cast %455 : vector<1x1x32xf32> to vector<1x32xf32>
    %c1_160 = arith.constant 1 : index
    %c0_161 = arith.constant 0 : index
    %c0_162 = arith.constant 0 : index
    %457 = vector.load %arg10[%c1_160, %c0_161, %c0_162] : memref<2x1x32xf32, #tpu.memory_space<vmem>>, vector<1x1x32xf32>
    %458 = vector.shape_cast %457 : vector<1x1x32xf32> to vector<1x32xf32>
    %cst_163 = arith.constant dense<0.000000e+00> : vector<16xf32>
    %459 = vector.multi_reduction <add>, %454, %cst_163 [1] : vector<16x32xf32> to vector<16xf32>
    %460 = vector.shape_cast %459 : vector<16xf32> to vector<16x1xf32>
    %cst_164 = arith.constant 3.200000e+01 : f32
    %461 = vector.broadcast %cst_164 : f32 to vector<16x1xf32>
    %462 = arith.divf %460, %461 : vector<16x1xf32>
    %463 = vector.broadcast %462 : vector<16x1xf32> to vector<16x32xf32>
    %464 = arith.subf %454, %463 : vector<16x32xf32>
    %465 = arith.mulf %464, %464 : vector<16x32xf32>
    %cst_165 = arith.constant dense<0.000000e+00> : vector<16xf32>
    %466 = vector.multi_reduction <add>, %465, %cst_165 [1] : vector<16x32xf32> to vector<16xf32>
    %467 = vector.shape_cast %466 : vector<16xf32> to vector<16x1xf32>
    %cst_166 = arith.constant 3.200000e+01 : f32
    %468 = vector.broadcast %cst_166 : f32 to vector<16x1xf32>
    %469 = arith.divf %467, %468 : vector<16x1xf32>
    %cst_167 = arith.constant 9.99999974E-6 : f32
    %470 = vector.broadcast %cst_167 : f32 to vector<16x1xf32>
    %471 = arith.addf %469, %470 : vector<16x1xf32>
    %472 = math.rsqrt %471 : vector<16x1xf32>
    %473 = vector.broadcast %472 : vector<16x1xf32> to vector<16x32xf32>
    %474 = arith.mulf %464, %473 : vector<16x32xf32>
    %475 = vector.broadcast %456 : vector<1x32xf32> to vector<16x32xf32>
    %476 = arith.mulf %474, %475 : vector<16x32xf32>
    %477 = vector.broadcast %458 : vector<1x32xf32> to vector<16x32xf32>
    %478 = arith.addf %476, %477 : vector<16x32xf32>
    %c1_168 = arith.constant 1 : index
    %c0_169 = arith.constant 0 : index
    %c0_170 = arith.constant 0 : index
    %479 = vector.load %arg11[%c1_168, %c0_169, %c0_170] : memref<2x32x64xf32, #tpu.memory_space<vmem>>, vector<1x32x64xf32>
    %480 = vector.shape_cast %479 : vector<1x32x64xf32> to vector<32x64xf32>
    %cst_171 = arith.constant dense<0.000000e+00> : vector<16x64xf32>
    %481 = tpu.matmul %478, %480, %cst_171 {dimension_numbers = #tpu.dot_dimension_numbers<[1], [0], [0], [1], [0, 0, 1, 1], [], []>} : vector<16x32xf32>, vector<32x64xf32>, vector<16x64xf32> -> vector<16x64xf32>
    %c1_172 = arith.constant 1 : index
    %c0_173 = arith.constant 0 : index
    %c0_174 = arith.constant 0 : index
    %482 = vector.load %arg12[%c1_172, %c0_173, %c0_174] : memref<2x1x64xf32, #tpu.memory_space<vmem>>, vector<1x1x64xf32>
    %483 = vector.shape_cast %482 : vector<1x1x64xf32> to vector<1x64xf32>
    %484 = vector.broadcast %483 : vector<1x64xf32> to vector<16x64xf32>
    %485 = arith.addf %481, %484 : vector<16x64xf32>
    %cst_175 = arith.constant 5.000000e-01 : f32
    %486 = vector.broadcast %cst_175 : f32 to vector<16x64xf32>
    %487 = arith.mulf %486, %485 : vector<16x64xf32>
    %cst_176 = arith.constant 0.707106769 : f32
    %488 = vector.broadcast %cst_176 : f32 to vector<16x64xf32>
    %489 = arith.mulf %485, %488 : vector<16x64xf32>
    %490 = math.erf %489 : vector<16x64xf32>
    %cst_177 = arith.constant 1.000000e+00 : f32
    %491 = vector.broadcast %cst_177 : f32 to vector<16x64xf32>
    %492 = arith.addf %491, %490 : vector<16x64xf32>
    %493 = arith.mulf %487, %492 : vector<16x64xf32>
    %c1_178 = arith.constant 1 : index
    %c0_179 = arith.constant 0 : index
    %c0_180 = arith.constant 0 : index
    %494 = vector.load %arg13[%c1_178, %c0_179, %c0_180] : memref<2x64x32xf32, #tpu.memory_space<vmem>>, vector<1x64x32xf32>
    %495 = vector.shape_cast %494 : vector<1x64x32xf32> to vector<64x32xf32>
    %cst_181 = arith.constant dense<0.000000e+00> : vector<16x32xf32>
    %496 = tpu.matmul %493, %495, %cst_181 {dimension_numbers = #tpu.dot_dimension_numbers<[1], [0], [0], [1], [0, 0, 1, 1], [], []>} : vector<16x64xf32>, vector<64x32xf32>, vector<16x32xf32> -> vector<16x32xf32>
    %c1_182 = arith.constant 1 : index
    %c0_183 = arith.constant 0 : index
    %c0_184 = arith.constant 0 : index
    %497 = vector.load %arg14[%c1_182, %c0_183, %c0_184] : memref<2x1x32xf32, #tpu.memory_space<vmem>>, vector<1x1x32xf32>
    %498 = vector.shape_cast %497 : vector<1x1x32xf32> to vector<1x32xf32>
    %499 = vector.broadcast %498 : vector<1x32xf32> to vector<16x32xf32>
    %500 = arith.addf %496, %499 : vector<16x32xf32>
    %501 = arith.addf %478, %500 : vector<16x32xf32>
    %c1_185 = arith.constant 1 : index
    %c0_186 = arith.constant 0 : index
    %c0_187 = arith.constant 0 : index
    %502 = vector.load %arg15[%c1_185, %c0_186, %c0_187] : memref<2x1x32xf32, #tpu.memory_space<vmem>>, vector<1x1x32xf32>
    %503 = vector.shape_cast %502 : vector<1x1x32xf32> to vector<1x32xf32>
    %c1_188 = arith.constant 1 : index
    %c0_189 = arith.constant 0 : index
    %c0_190 = arith.constant 0 : index
    %504 = vector.load %arg16[%c1_188, %c0_189, %c0_190] : memref<2x1x32xf32, #tpu.memory_space<vmem>>, vector<1x1x32xf32>
    %505 = vector.shape_cast %504 : vector<1x1x32xf32> to vector<1x32xf32>
    %cst_191 = arith.constant dense<0.000000e+00> : vector<16xf32>
    %506 = vector.multi_reduction <add>, %501, %cst_191 [1] : vector<16x32xf32> to vector<16xf32>
    %507 = vector.shape_cast %506 : vector<16xf32> to vector<16x1xf32>
    %cst_192 = arith.constant 3.200000e+01 : f32
    %508 = vector.broadcast %cst_192 : f32 to vector<16x1xf32>
    %509 = arith.divf %507, %508 : vector<16x1xf32>
    %510 = vector.broadcast %509 : vector<16x1xf32> to vector<16x32xf32>
    %511 = arith.subf %501, %510 : vector<16x32xf32>
    %512 = arith.mulf %511, %511 : vector<16x32xf32>
    %cst_193 = arith.constant dense<0.000000e+00> : vector<16xf32>
    %513 = vector.multi_reduction <add>, %512, %cst_193 [1] : vector<16x32xf32> to vector<16xf32>
    %514 = vector.shape_cast %513 : vector<16xf32> to vector<16x1xf32>
    %cst_194 = arith.constant 3.200000e+01 : f32
    %515 = vector.broadcast %cst_194 : f32 to vector<16x1xf32>
    %516 = arith.divf %514, %515 : vector<16x1xf32>
    %cst_195 = arith.constant 9.99999974E-6 : f32
    %517 = vector.broadcast %cst_195 : f32 to vector<16x1xf32>
    %518 = arith.addf %516, %517 : vector<16x1xf32>
    %519 = math.rsqrt %518 : vector<16x1xf32>
    %520 = vector.broadcast %519 : vector<16x1xf32> to vector<16x32xf32>
    %521 = arith.mulf %511, %520 : vector<16x32xf32>
    %522 = vector.broadcast %503 : vector<1x32xf32> to vector<16x32xf32>
    %523 = arith.mulf %521, %522 : vector<16x32xf32>
    %524 = vector.broadcast %505 : vector<1x32xf32> to vector<16x32xf32>
    %525 = arith.addf %523, %524 : vector<16x32xf32>
    %c0_196 = arith.constant 0 : index
    %c0_197 = arith.constant 0 : index
    %526 = vector.load %arg17[%c0_196, %c0_197] : memref<16x32xf32, #tpu.memory_space<vmem>>, vector<16x32xf32>
    tpu.vector_store %arg17[%c0_196, %c0_197], %525 {strides = array<i32>} : memref<16x32xf32, #tpu.memory_space<vmem>>, vector<16x32xf32>,
    return
  }
  func.func @transform_0(%arg0: i32) -> (i32, i32) {
    %c0_i32 = arith.constant 0 : i32
    %c0_i32_0 = arith.constant 0 : i32
    %c0_i32_1 = arith.constant 0 : i32
    return %c0_i32, %c0_i32_0 : i32, i32
  }
  func.func @transform_1(%arg0: i32) -> (i32, i32) {
    %c0_i32 = arith.constant 0 : i32
    %c0_i32_0 = arith.constant 0 : i32
    %c0_i32_1 = arith.constant 0 : i32
    return %c0_i32, %c0_i32_0 : i32, i32
  }
  func.func @transform_2(%arg0: i32) -> (i32, i32) {
    %c0_i32 = arith.constant 0 : i32
    %c0_i32_0 = arith.constant 0 : i32
    %c0_i32_1 = arith.constant 0 : i32
    return %c0_i32, %c0_i32_0 : i32, i32
  }
  func.func @transform_3(%arg0: i32) -> (i32, i32) {
    %c0_i32 = arith.constant 0 : i32
    %c0_i32_0 = arith.constant 0 : i32
    %c0_i32_1 = arith.constant 0 : i32
    return %c0_i32, %c0_i32_0 : i32, i32
  }
  func.func @transform_4(%arg0: i32) -> (i32, i32, i32) {
    %c0_i32 = arith.constant 0 : i32
    %c0_i32_0 = arith.constant 0 : i32
    %c0_i32_1 = arith.constant 0 : i32
    %c0_i32_2 = arith.constant 0 : i32
    return %c0_i32, %c0_i32_0, %c0_i32_1 : i32, i32, i32
  }
  func.func @transform_5(%arg0: i32) -> (i32, i32, i32) {
    %c0_i32 = arith.constant 0 : i32
    %c0_i32_0 = arith.constant 0 : i32
    %c0_i32_1 = arith.constant 0 : i32
    %c0_i32_2 = arith.constant 0 : i32
    return %c0_i32, %c0_i32_0, %c0_i32_1 : i32, i32, i32
  }
  func.func @transform_6(%arg0: i32) -> (i32, i32, i32) {
    %c0_i32 = arith.constant 0 : i32
    %c0_i32_0 = arith.constant 0 : i32
    %c0_i32_1 = arith.constant 0 : i32
    %c0_i32_2 = arith.constant 0 : i32
    return %c0_i32, %c0_i32_0, %c0_i32_1 : i32, i32, i32
  }
  func.func @transform_7(%arg0: i32) -> (i32, i32, i32) {
    %c0_i32 = arith.constant 0 : i32
    %c0_i32_0 = arith.constant 0 : i32
    %c0_i32_1 = arith.constant 0 : i32
    %c0_i32_2 = arith.constant 0 : i32
    return %c0_i32, %c0_i32_0, %c0_i32_1 : i32, i32, i32
  }
  func.func @transform_8(%arg0: i32) -> (i32, i32, i32) {
    %c0_i32 = arith.constant 0 : i32
    %c0_i32_0 = arith.constant 0 : i32
    %c0_i32_1 = arith.constant 0 : i32
    %c0_i32_2 = arith.constant 0 : i32
    return %c0_i32, %c0_i32_0, %c0_i32_1 : i32, i32, i32
  }
  func.func @transform_9(%arg0: i32) -> (i32, i32, i32) {
    %c0_i32 = arith.constant 0 : i32
    %c0_i32_0 = arith.constant 0 : i32
    %c0_i32_1 = arith.constant 0 : i32
    %c0_i32_2 = arith.constant 0 : i32
    return %c0_i32, %c0_i32_0, %c0_i32_1 : i32, i32, i32
  }
  func.func @transform_10(%arg0: i32) -> (i32, i32, i32) {
    %c0_i32 = arith.constant 0 : i32
    %c0_i32_0 = arith.constant 0 : i32
    %c0_i32_1 = arith.constant 0 : i32
    %c0_i32_2 = arith.constant 0 : i32
    return %c0_i32, %c0_i32_0, %c0_i32_1 : i32, i32, i32
  }
  func.func @transform_11(%arg0: i32) -> (i32, i32, i32) {
    %c0_i32 = arith.constant 0 : i32
    %c0_i32_0 = arith.constant 0 : i32
    %c0_i32_1 = arith.constant 0 : i32
    %c0_i32_2 = arith.constant 0 : i32
    return %c0_i32, %c0_i32_0, %c0_i32_1 : i32, i32, i32
  }
  func.func @transform_12(%arg0: i32) -> (i32, i32, i32) {
    %c0_i32 = arith.constant 0 : i32
    %c0_i32_0 = arith.constant 0 : i32
    %c0_i32_1 = arith.constant 0 : i32
    %c0_i32_2 = arith.constant 0 : i32
    return %c0_i32, %c0_i32_0, %c0_i32_1 : i32, i32, i32
  }
  func.func @transform_13(%arg0: i32) -> (i32, i32, i32) {
    %c0_i32 = arith.constant 0 : i32
    %c0_i32_0 = arith.constant 0 : i32
    %c0_i32_1 = arith.constant 0 : i32
    %c0_i32_2 = arith.constant 0 : i32
    return %c0_i32, %c0_i32_0, %c0_i32_1 : i32, i32, i32
  }
  func.func @transform_14(%arg0: i32) -> (i32, i32, i32) {
    %c0_i32 = arith.constant 0 : i32
    %c0_i32_0 = arith.constant 0 : i32
    %c0_i32_1 = arith.constant 0 : i32
    %c0_i32_2 = arith.constant 0 : i32
    return %c0_i32, %c0_i32_0, %c0_i32_1 : i32, i32, i32
  }
  func.func @transform_15(%arg0: i32) -> (i32, i32, i32) {
    %c0_i32 = arith.constant 0 : i32
    %c0_i32_0 = arith.constant 0 : i32
    %c0_i32_1 = arith.constant 0 : i32
    %c0_i32_2 = arith.constant 0 : i32
    return %c0_i32, %c0_i32_0, %c0_i32_1 : i32, i32, i32
  }
  func.func @transform_16(%arg0: i32) -> (i32, i32) {
    %c0_i32 = arith.constant 0 : i32
    %c0_i32_0 = arith.constant 0 : i32
    %c0_i32_1 = arith.constant 0 : i32
    return %c0_i32, %c0_i32_0 : i32, i32
  }
}

</mosaic_0001>

<bundles_post_ra>
// kernel: roberta_embedder_forward.1
= control target key start
LH: loop header
LB: loop body
LE: loop exit
PB: predicated region body
PF: predicated region fallthrough
CT: control target
= control target key end

     0   :  { %s5163_s0 = inlined_call_operand.vmem [shape: f32[16,32], index: 0, kind: input, shape index: {}]   ;;  %s5164_s1 = inlined_call_operand.vmem [shape: f32[2,8], index: 1, kind: input, shape index: {}]   ;;  %s5165_s2 = inlined_call_operand.vmem [shape: f32[1,32], index: 2, kind: input, shape index: {}]   ;;  %s5166_s3 = inlined_call_operand.vmem [shape: f32[1,32], index: 3, kind: input, shape index: {}]   ;;  %s5167_s4 = inlined_call_operand.vmem [shape: f32[2,32,96], index: 4, kind: input, shape index: {}]   ;;  %s5168_s5 = inlined_call_operand.vmem [shape: f32[2,1,96], index: 5, kind: input, shape index: {}]   ;;  %s5169_s6 = inlined_call_operand.vmem [shape: f32[2,32,32], index: 6, kind: input, shape index: {}]   ;;  %s5170_s7 = inlined_call_operand.vmem [shape: f32[2,1,32], index: 7, kind: input, shape index: {}]   ;;  %s5171_s8 = inlined_call_operand.vmem [shape: f32[2,1,32], index: 8, kind: input, shape index: {}]   ;;  %s5172_s9 = inlined_call_operand.vmem [shape: f32[2,1,32], index: 9, kind: input, shape index: {}]   ;;  %s5173_s10 = inlined_call_operand.vmem [shape: f32[2,32,64], index: 10, kind: input, shape index: {}]   ;;  %s5174_s11 = inlined_call_operand.vmem [shape: f32[2,1,64], index: 11, kind: input, shape index: {}]   ;;  %s5175_s12 = inlined_call_operand.vmem [shape: f32[2,64,32], index: 12, kind: input, shape index: {}]   ;;  %s5176_s13 = inlined_call_operand.vmem [shape: f32[2,1,32], index: 13, kind: input, shape index: {}]   ;;  %s5177_s14 = inlined_call_operand.vmem [shape: f32[2,1,32], index: 14, kind: input, shape index: {}]   ;;  %s5178_s15 = inlined_call_operand.vmem [shape: f32[2,1,32], index: 15, kind: input, shape index: {}]   ;;  %s5179_s16 = inlined_call_operand.hbm [shape: f32[16,32], index: 16, kind: output, shape index: {}]  }
   0x1   :  { %5189 = sst [smem:[#allocation5_spill]] %s5163_s0 }
   0x2   :  { %s5190_s23 = sld [smem:[#allocation5_spill]]  ;;  %vm58_vm0 = vcmask 261120  }
   0x8   :  { %v54_v0 = vld [vmem:[%s5190_s23] sm:$0xff]  ;;  %v55_v1 = vld [vmem:[%s5190_s23 + $0x8] sm:$0xff] }
   0x9   :  { %21 = vsyncpa [#allocation3], 0  ;;  %v59_v2 = vsel %vm58_vm0, %v54_v0, 0.0  ;;  %v62_v3 = vsel %vm58_vm0, %v55_v1, 0.0  ;;  %v106_v14 = vld [vmem:[%s5167_s4 + $0x18] sm:$0xff]  ;;  %v105_v15 = vld [vmem:[%s5167_s4 + $0x10] sm:$0xff]  ;;  %v274_v54 = vlaneseq }
   0xa   :  { %60 = vadd.xlane.f32.xlu0 %v59_v2  ;;  %4051 = vmatprep.subr.mxu1 %v106_v14  ;;  %v104_v16 = vld [vmem:[%s5167_s4 + $0x8] sm:$0xff]  ;;  %v103_v17 = vld [vmem:[%s5167_s4] sm:$0xff]  ;;  %v4447_v34 = vmov 0.0   ;;  %vm4448_vm1 = vmmov 0   ;;  %s4449_s23 = smov 88   ;;  %s4450_s24 = smov 96  }
   0xb   :  { %4052 = vmatpush3.msra.mxu1 %v106_v14  ;;  %v3821_v25 = vld [vmem:[%s5165_s2] ss:$0 sm:$0xff]  ;;  %4072 = vmatprep.subr.mxu0 %v4447_v34  ;;  %s4451_s25 = smov 120   ;;  %s4452_s26 = smov 112   ;;  %vm198_vm2 = vcmask 64512   ;;  %v275_v55 = vshrl.u32 %v274_v54, 7 }
   0xc   :  { %4053 = vmatprep.subr.mxu1 %v105_v15  ;;  %v3822_v27 = vld [vmem:[%s5166_s3] ss:$0 sm:$0xff]  ;;  %4074 = vmatprep.mubr.msk.f32.mxu0 %vm4448_vm1, %v4447_v34  ;;  %s4453_s27 = smov 80   ;;  %s4454_s28 = smov 104   ;;  %vm880_vm3 = vcmask 130048   ;;  %vm882_vm4 = vcmask 195584  }
   0xd   :  { %4054 = vmatpush3.msra.mxu1 %v105_v15  ;;  %v3823_v36 = vld [vmem:[%s5168_s5] ss:$0 sm:$0xff]  ;;  %s4455_s29 = smov 72   ;;  %v276_v56 = vsub.s32 0, %v275_v55  ;;  %s4457_s17 = smov 48   ;;  %vm1825_vm5 = vcmask 523264  }
   0xe   :  { %63 = vadd.xlane.f32.xlu0 %v62_v3  ;;  %4055 = vmatprep.subr.mxu1 %v104_v16  ;;  %v102_v57 = vld [vmem:[%s5164_s1] sm:$0x3]  ;;  %s4456_s1 = smov 64   ;;  %s5183_s18 = smov 40  }
   0xf   :  { %4056 = vmatpush3.msra.mxu1 %v104_v16  ;;  %v4669_v58 = vrot.slane %v102_v57, %v276_v56  ;;  %s5181_s19 = smov 56   ;;  %s4460_s20 = smov 8  }
  0x10   :  { %4057 = vmatprep.subr.mxu1 %v103_v17  ;;  %s5187_s30 = smov 16   ;;  %s5185_s22 = smov 24  }
  0x11   :  { %4058 = vmatpush3.msra.mxu1 %v103_v17 }
  0x12   :  { %4062 = vmatprep.subr.mxu1 %v4447_v34 }
  0x93   :  { %v61_v4 = vpop.xlane.xlu0 %60 }
  0x94   :  { %v66_v5 = vmul.f32 0.03125, %v61_v4 }
  0x96   :  { %v68_v6 = vsub.f32 %v54_v0, %v66_v5 }
  0x97   :  { %v64_v7 = vpop.xlane.xlu0 %63 }
  0x98   :  { %v67_v8 = vmul.f32 0.03125, %v64_v7  ;;  %v70_v9 = vmul.f32 %v68_v6, %v68_v6 }
  0x9a   :  { %v69_v10 = vsub.f32 %v55_v1, %v67_v8  ;;  %v72_v11 = vsel %vm58_vm0, %v70_v9, 0.0  ;;  %v964_v9 = vsub.s32 1, %v275_v55 }
  0x9b   :  { %73 = vadd.xlane.f32.xlu1 %v72_v11 }
  0x9c   :  { %v71_v12 = vmul.f32 %v69_v10, %v69_v10  ;;  %v4681_v15 = vrot.slane %v102_v57, %v964_v9 }
  0x9e   :  { %v75_v13 = vsel %vm58_vm0, %v71_v12, 0.0 }
  0x9f   :  { %76 = vadd.xlane.f32.xlu1 %v75_v13 }
 0x124   :  { %v74_v18 = vpop.xlane.xlu1 %73 }
 0x125   :  { %v78_v19 = vmul.f32 0.03125, %v74_v18 }
 0x127   :  { %v80_v20 = vadd.f32 1e-05, %v78_v19 }
 0x128   :  { %v77_v21 = vpop.xlane.xlu1 %76 }
 0x129   :  { %4333 = vrsqrt.f32 %v80_v20  ;;  %v79_v22 = vmul.f32 0.03125, %v77_v21 }
 0x12b   :  { %v81_v23 = vadd.f32 1e-05, %v79_v22 }
 0x12d   :  { %4335 = vrsqrt.f32 %v81_v23 }
 0x136   :  { %v4334_v24 = vpop.eup %4333 }
 0x137   :  { %v84_v26 = vmul.f32 %v4334_v24, %v68_v6 }
 0x139   :  { %v92_v28 = vmul.f32 %v3821_v25, %v84_v26 }
 0x13a   :  { %v4336_v29 = vpop.eup %4335 }
 0x13b   :  { %v85_v30 = vmul.f32 %v4336_v29, %v69_v10  ;;  %v4578_v31 = vadd.f32 %v3822_v27, %v92_v28 }
 0x13d   :  { %v93_v32 = vmul.f32 %v3821_v25, %v85_v30  ;;  %4059 = vmatprep.mubr.msk.f32.mxu1 %vm58_vm0, %v4578_v31 }
 0x13f   :  { %v4582_v33 = vadd.f32 %v3822_v27, %v93_v32 }
 0x141   :  { %4060 = vmatmul.mubr.msk.f32.vlgmr.msra.gmra.mxu1 %vm58_vm0, %v4582_v33 }
 0x142   :  { %4064 = vmatprep.mubr.msk.f32.mxu1 %vm4448_vm1, %v4447_v34 }
 0x201   :  { %v4061_v35 = vpop.f32.mrf.mxu1 }
 0x202   :  { %v4609_v39 = vadd.f32 %v4061_v35, %v3823_v36 }
 0x203   :  { %v186_v37 = vpop.f32.mrf.mxu1 }
 0x204   :  { %v4595_v38 = vadd.f32 %v3823_v36, %v186_v37 }
 0x206   :  { %368 = vrot.lane.b32.xlu1 %v4595_v38, %s4449_s23  ;;  %196 = vrot.lane.b32.xlu0 %v4595_v38, %s4450_s24 }
 0x20a   :  { %366 = vrot.lane.b32.xlu1 %v4595_v38, %s4451_s25  ;;  %533 = vrot.lane.b32.xlu0 %v4595_v38, %s4452_s26 }
 0x20e   :  { %535 = vrot.lane.b32.xlu1 %v4595_v38, %s4453_s27  ;;  %700 = vrot.lane.b32.xlu0 %v4595_v38, %s4454_s28 }
 0x212   :  { %702 = vrot.lane.b32.xlu1 %v4595_v38, %s4455_s29  ;;  %1056 = vrot.lane.b32.xlu0 %v4609_v39, %s4449_s23 }
 0x216   :  { %885 = vrot.lane.b32.xlu1 %v4609_v39, %s4450_s24  ;;  %1223 = vrot.lane.b32.xlu0 %v4609_v39, %s4453_s27 }
 0x21a   :  { %1054 = vrot.lane.b32.xlu1 %v4609_v39, %s4451_s25  ;;  %1390 = vrot.lane.b32.xlu0 %v4609_v39, %s4455_s29 }
 0x21e   :  { %1221 = vrot.lane.b32.xlu1 %v4609_v39, %s4452_s26 }
 0x222   :  { %1388 = vrot.lane.b32.xlu1 %v4609_v39, %s4454_s28 }
 0x278   :  { %v369_v40 = vpop.permute.xlu1 %368  ;;  %v197_v41 = vpop.permute.xlu0 %196 }
 0x279   :  { %4063 = vmatpush3.xpose.msk.msra.mxu1 %vm198_vm2, %v197_v41  ;;  %4073 = vmatpush3.xpose.msk.msra.mxu0 %vm198_vm2, %v369_v40 }
 0x27a   :  { %4082 = vmatprep.subr.mxu0 %v4447_v34  ;;  %4067 = vmatprep.subr.mxu1 %v4447_v34 }
 0x27c   :  { %v367_v42 = vpop.permute.xlu1 %366  ;;  %4065 = vmatmul.mubr.msk.f32.vlgmr.msra.gmra.mxu1 %vm198_vm2, %v4595_v38  ;;  %v534_v43 = vpop.permute.xlu0 %533 }
 0x27d   :  { %4075 = vmatmul.mubr.msk.f32.vlgmr.msra.gmra.mxu0 %vm198_vm2, %v367_v42  ;;  %4069 = vmatprep.mubr.msk.f32.mxu1 %vm4448_vm1, %v4447_v34 }
 0x27e   :  { %4084 = vmatprep.mubr.msk.f32.mxu0 %vm4448_vm1, %v4447_v34 }
 0x280   :  { %v536_v44 = vpop.permute.xlu1 %535  ;;  %v701_v45 = vpop.permute.xlu0 %700 }
 0x281   :  { %4083 = vmatpush3.xpose.msk.msra.mxu0 %vm198_vm2, %v536_v44 }
 0x282   :  { %4092 = vmatprep.subr.mxu0 %v4447_v34 }
 0x284   :  { %v703_v46 = vpop.permute.xlu1 %702  ;;  %4085 = vmatmul.mubr.msk.f32.vlgmr.msra.gmra.mxu0 %vm198_vm2, %v534_v43  ;;  %v1057_v47 = vpop.permute.xlu0 %1056 }
 0x285   :  { %4093 = vmatpush3.xpose.msk.msra.mxu0 %vm198_vm2, %v703_v46  ;;  %4094 = vmatprep.mubr.msk.f32.mxu0 %vm4448_vm1, %v4447_v34 }
 0x286   :  { %4102 = vmatprep.subr.mxu0 %v4447_v34 }
 0x288   :  { %v886_v48 = vpop.permute.xlu1 %885  ;;  %4095 = vmatmul.mubr.msk.f32.vlgmr.msra.gmra.mxu0 %vm198_vm2, %v701_v45  ;;  %v1224_v50 = vpop.permute.xlu0 %1223 }
 0x289   :  { %4103 = vmatpush3.xpose.msk.msra.mxu0 %vm198_vm2, %v886_v48  ;;  %4104 = vmatprep.mubr.msk.f32.mxu0 %vm4448_vm1, %v4447_v34 }
 0x28a   :  { %4112 = vmatprep.subr.mxu0 %v4447_v34 }
 0x28c   :  { %v1055_v49 = vpop.permute.xlu1 %1054  ;;  %4105 = vmatmul.mubr.msk.f32.vlgmr.msra.gmra.mxu0 %vm198_vm2, %v4609_v39  ;;  %v1391_v52 = vpop.permute.xlu0 %1390 }
 0x28d   :  { %4113 = vmatpush3.xpose.msk.msra.mxu0 %vm198_vm2, %v1057_v47  ;;  %4114 = vmatprep.mubr.msk.f32.mxu0 %vm4448_vm1, %v4447_v34 }
 0x28e   :  { %4122 = vmatprep.subr.mxu0 %v4447_v34 }
 0x290   :  { %4115 = vmatmul.mubr.msk.f32.vlgmr.msra.gmra.mxu0 %vm198_vm2, %v1055_v49  ;;  %v1222_v51 = vpop.permute.xlu1 %1221 }
 0x291   :  { %4123 = vmatpush3.xpose.msk.msra.mxu0 %vm198_vm2, %v1224_v50  ;;  %4124 = vmatprep.mubr.msk.f32.mxu0 %vm4448_vm1, %v4447_v34 }
 0x292   :  { %4132 = vmatprep.subr.mxu0 %v4447_v34 }
 0x294   :  { %4125 = vmatmul.mubr.msk.f32.vlgmr.msra.gmra.mxu0 %vm198_vm2, %v1222_v51  ;;  %v1389_v53 = vpop.permute.xlu1 %1388 }
 0x295   :  { %4133 = vmatpush3.xpose.msk.msra.mxu0 %vm198_vm2, %v1391_v52  ;;  %4134 = vmatprep.mubr.msk.f32.mxu0 %vm4448_vm1, %v4447_v34 }
 0x298   :  { %4135 = vmatmul.mubr.msk.f32.vlgmr.msra.gmra.mxu0 %vm198_vm2, %v1389_v53 }
 0x33c   :  { %v269_v59 = vpop.f32.mrf.mxu1 }
 0x33d   :  { %v273_v60 = vmul.f32 0.35355338, %v269_v59  ;;  %v440_v61 = vpop.f32.mrf.mxu0 }
 0x33e   :  { %v444_v62 = vmul.f32 0.35355338, %v440_v61  ;;  %v4066_v63 = vpop.f32.mrf.mxu1 }
 0x33f   :  { %v4076_v0 = vpop.f32.mrf.mxu0  ;;  %v278_v1 = vadd.f32 %v4669_v58, %v273_v60 }
 0x340   :  { %v445_v2 = vadd.f32 %v444_v62, %v4669_v58 }
 0x341   :  { %v279_v3 = vsel %vm198_vm2, %v278_v1, -inf }
 0x342   :  { %280 = vmax.xlane.f32.xlu0 %v279_v3  ;;  %v446_v4 = vsel %vm198_vm2, %v445_v2, -inf }
 0x343   :  { %447 = vmax.xlane.f32.xlu1 %v446_v4 }
 0x344   :  { %v607_v5 = vpop.f32.mrf.mxu0 }
 0x345   :  { %v611_v6 = vmul.f32 0.35355338, %v607_v5 }
 0x346   :  { %v4086_v7 = vpop.f32.mrf.mxu0 }
 0x347   :  { %v4676_v8 = vadd.f32 %v611_v6, %v4669_v58 }
 0x348   :  { %v774_v10 = vpop.f32.mrf.mxu0 }
 0x349   :  { %v778_v11 = vmul.f32 0.35355338, %v774_v10  ;;  %v613_v12 = vsel %vm198_vm2, %v4676_v8, -inf }
 0x34a   :  { %614 = vmax.xlane.f32.xlu0 %v613_v12  ;;  %v4096_v13 = vpop.f32.mrf.mxu0 }
 0x34b   :  { %v779_v14 = vadd.f32 %v778_v11, %v4669_v58 }
 0x34c   :  { %v957_v16 = vpop.f32.mrf.mxu0 }
 0x34d   :  { %v961_v17 = vmul.f32 0.35355338, %v957_v16  ;;  %v780_v18 = vsel %vm198_vm2, %v779_v14, -inf }
 0x34e   :  { %781 = vmax.xlane.f32.xlu0 %v780_v18  ;;  %v4106_v19 = vpop.f32.mrf.mxu0 }
 0x34f   :  { %v4685_v20 = vadd.f32 %v4681_v15, %v961_v17 }
 0x350   :  { %v1128_v21 = vpop.f32.mrf.mxu0 }
 0x351   :  { %v1132_v22 = vmul.f32 0.35355338, %v1128_v21  ;;  %v967_v23 = vsel %vm198_vm2, %v4685_v20, -inf }
 0x352   :  { %968 = vmax.xlane.f32.xlu0 %v967_v23  ;;  %v4116_v24 = vpop.f32.mrf.mxu0 }
 0x353   :  { %v1133_v25 = vadd.f32 %v1132_v22, %v4681_v15 }
 0x354   :  { %v1295_v26 = vpop.f32.mrf.mxu0 }
 0x355   :  { %v1299_v27 = vmul.f32 0.35355338, %v1295_v26  ;;  %v1134_v28 = vsel %vm198_vm2, %v1133_v25, -inf }
 0x356   :  { %1135 = vmax.xlane.f32.xlu1 %v1134_v28  ;;  %v4126_v29 = vpop.f32.mrf.mxu0 }
 0x357   :  { %v1300_v30 = vadd.f32 %v1299_v27, %v4681_v15 }
 0x358   :  { %v1462_v32 = vpop.f32.mrf.mxu0 }
 0x359   :  { %v1301_v35 = vsel %vm198_vm2, %v1300_v30, -inf  ;;  %v1466_v37 = vmul.f32 0.35355338, %v1462_v32 }
 0x35a   :  { %1302 = vmax.xlane.f32.xlu0 %v1301_v35  ;;  %v4136_v36 = vpop.f32.mrf.mxu0 }
 0x35b   :  { %v1467_v40 = vadd.f32 %v1466_v37, %v4681_v15 }
 0x35d   :  { %v1468_v41 = vsel %vm198_vm2, %v1467_v40, -inf }
 0x367   :  { %290 = vrot.lane.b32.xlu1 %v4595_v38, %s4456_s1 }
 0x38b   :  { %1469 = vmax.xlane.f32.xlu1 %v1468_v41 }
 0x39c   :  { %624 = vrot.lane.b32.xlu1 %v4595_v38, %s4457_s17 }
 0x3a0   :  { %791 = vrot.lane.b32.xlu1 %v4595_v38, %s5183_s18 }
 0x3a4   :  { %978 = vrot.lane.b32.xlu1 %v4609_v39, %s4456_s1 }
 0x3cb   :  { %v281_v42 = vpop.xlane.xlu0 %280 }
 0x3cc   :  { %v282_v43 = vsub.f32 %v278_v1, %v281_v42  ;;  %v448_v44 = vpop.xlane.xlu1 %447 }
 0x3cd   :  { %v449_v45 = vsub.f32 %v445_v2, %v448_v44 }
 0x3ce   :  { %v283_v46 = vmul.f32 1.442695, %v282_v43 }
 0x3cf   :  { %v450_v47 = vmul.f32 1.442695, %v449_v45 }
 0x3d0   :  { %4337 = vpow2.f32 %v283_v46 }
 0x3d1   :  { %4339 = vpow2.f32 %v450_v47 }
 0x3d3   :  { %v615_v48 = vpop.xlane.xlu0 %614 }
 0x3d4   :  { %v616_v61 = vsub.f32 %v4676_v8, %v615_v48 }
 0x3d6   :  { %v617_v63 = vmul.f32 1.442695, %v616_v61  ;;  %v1573_v61 = vld [vmem:[%s5169_s6 + $0x18] sm:$0xff] }
 0x3d7   :  { %v782_v49 = vpop.xlane.xlu0 %781  ;;  %4142 = vmatprep.subr.mxu0 %v1573_v61 }
 0x3d8   :  { %v783_v50 = vsub.f32 %v779_v14, %v782_v49  ;;  %4143 = vmatpush3.msra.mxu0 %v1573_v61 }
 0x3da   :  { %v784_v51 = vmul.f32 1.442695, %v783_v50 }
 0x3db   :  { %v969_v62 = vpop.xlane.xlu0 %968 }
 0x3dc   :  { %4341 = vpow2.f32 %v784_v51  ;;  %v970_v0 = vsub.f32 %v4685_v20, %v969_v62  ;;  %v1572_v62 = vld [vmem:[%s5169_s6 + $0x10] sm:$0xff] }
 0x3dd   :  { %v4338_v52 = vpop.eup %4337  ;;  %4343 = vpow2.f32 %v617_v63  ;;  %4144 = vmatprep.subr.mxu0 %v1572_v62 }
 0x3de   :  { %v4703_v53 = vpop.eup %4339  ;;  %v285_v54 = vsel %vm198_vm2, %v4338_v52, 0.0  ;;  %v971_v2 = vmul.f32 1.442695, %v970_v0  ;;  %4145 = vmatpush3.msra.mxu0 %v1572_v62 }
 0x3df   :  { %v1136_v55 = vpop.xlane.xlu1 %1135  ;;  %286 = vadd.xlane.f32.xlu0 %v285_v54  ;;  %v452_v56 = vsel %vm198_vm2, %v4703_v53, 0.0 }
 0x3e0   :  { %453 = vadd.xlane.f32.xlu1 %v452_v56  ;;  %4345 = vpow2.f32 %v971_v2  ;;  %v1137_v4 = vsub.f32 %v1133_v25, %v1136_v55  ;;  %v1570_v2 = vld [vmem:[%s5169_s6] sm:$0xff] }
 0x3e2   :  { %v1138_v6 = vmul.f32 1.442695, %v1137_v4 }
 0x3e3   :  { %v291_v57 = vpop.permute.xlu1 %290  ;;  %v1303_v1 = vpop.xlane.xlu0 %1302 }
 0x3e4   :  { %4068 = vmatpush3.msra.mxu1 %v291_v57  ;;  %v1304_v3 = vsub.f32 %v1300_v30, %v1303_v1  ;;  %v1571_v1 = vld [vmem:[%s5169_s6 + $0x8] sm:$0xff] }
 0x3e5   :  { %4077 = vmatprep.subr.mxu1 %v4447_v34  ;;  %4146 = vmatprep.subr.mxu0 %v1571_v1 }
 0x3e6   :  { %v1305_v5 = vmul.f32 1.442695, %v1304_v3  ;;  %4147 = vmatpush3.msra.mxu0 %v1571_v1 }
 0x3e7   :  { %4148 = vmatprep.subr.mxu0 %v1570_v2 }
 0x3e8   :  { %4347 = vpow2.f32 %v1305_v5  ;;  %4149 = vmatpush3.msra.mxu0 %v1570_v2  ;;  %v1817_v2 = vld [vmem:[%s5175_s12 + $0x38] sm:$0xff] }
 0x3e9   :  { %v4709_v59 = vpop.eup %4341  ;;  %4349 = vpow2.f32 %v1138_v6  ;;  %4164 = vmatprep.subr.mxu0 %v1817_v2 }
 0x3ea   :  { %v786_v60 = vsel %vm198_vm2, %v4709_v59, 0.0 }
 0x3eb   :  { %787 = vadd.xlane.f32.xlu1 %v786_v60 }
 0x3f5   :  { %457 = vrot.lane.b32.xlu0 %v4595_v38, %s5181_s19  ;;  %v4344_v38 = vpop.eup %4343 }
 0x3f6   :  { %v619_v7 = vsel %vm198_vm2, %v4344_v38, 0.0  ;;  %v4720_v8 = vpop.eup %4345 }
 0x3f7   :  { %v973_v12 = vsel %vm198_vm2, %v4720_v8, 0.0  ;;  %v4724_v13 = vpop.eup %4347 }
 0x3f8   :  { %v1307_v14 = vsel %vm198_vm2, %v4724_v13, 0.0  ;;  %v4350_v16 = vpop.eup %4349 }
 0x3f9   :  { %v1140_v17 = vsel %vm198_vm2, %v4350_v16, 0.0 }
 0x3fc   :  { %1145 = vrot.lane.b32.xlu1 %v4609_v39, %s5181_s19 }
 0x414   :  { %v1470_v9 = vpop.xlane.xlu1 %1469  ;;  %620 = vadd.xlane.f32.xlu0 %v619_v7 }
 0x415   :  { %v1471_v10 = vsub.f32 %v1467_v40, %v1470_v9 }
 0x417   :  { %v1472_v11 = vmul.f32 1.442695, %v1471_v10 }
 0x418   :  { %974 = vadd.xlane.f32.xlu0 %v973_v12  ;;  %v625_v20 = vpop.permute.xlu1 %624 }
 0x419   :  { %4351 = vpow2.f32 %v1472_v11 }
 0x41c   :  { %1308 = vadd.xlane.f32.xlu0 %v1307_v14  ;;  %v792_v21 = vpop.permute.xlu1 %791 }
 0x420   :  { %1141 = vadd.xlane.f32.xlu1 %v1140_v17  ;;  %v979_v22 = vpop.permute.xlu1 %978 }
 0x426   :  { %v4729_v18 = vpop.eup %4351 }
 0x427   :  { %v1474_v19 = vsel %vm198_vm2, %v4729_v18, 0.0 }
 0x428   :  { %1475 = vadd.xlane.f32.xlu0 %v1474_v19 }
 0x431   :  { %1479 = vrot.lane.b32.xlu1 %v4609_v39, %s5183_s18  ;;  %s5194_s18 = smov 24  }
 0x43e   :  { %1312 = vrot.lane.b32.xlu0 %v4609_v39, %s4457_s17 }
 0x468   :  { %v287_v23 = vpop.xlane.xlu0 %286 }
 0x469   :  { %4353 = vrcp.f32 %v287_v23  ;;  %v454_v24 = vpop.xlane.xlu1 %453 }
 0x46a   :  { %4355 = vrcp.f32 %v454_v24  ;;  %v3850_v24 = vld [vmem:[%s5170_s7] ss:$0 sm:$0xff] }
 0x46c   :  { %v458_v28 = vpop.permute.xlu0 %457 }
 0x474   :  { %v788_v29 = vpop.xlane.xlu1 %787 }
 0x476   :  { %v4354_v25 = vpop.eup %4353 }
 0x477   :  { %v289_v26 = vmul.f32 %v4354_v25, %v4338_v52  ;;  %v4356_v27 = vpop.eup %4355 }
 0x478   :  { %v456_v39 = vmul.f32 %v4356_v27, %v4703_v53  ;;  %v1146_v35 = vpop.permute.xlu1 %1145 }
 0x479   :  { %4070 = vmatmul.mubr.msk.f32.vlgmr.msra.gmra.mxu1 %vm198_vm2, %v289_v26 }
 0x47a   :  { %4078 = vmatpush3.msra.mxu1 %v458_v28  ;;  %4079 = vmatprep.mubr.msk.f32.mxu1 %vm4448_vm1, %v4447_v34 }
 0x47b   :  { %4087 = vmatprep.subr.mxu1 %v4447_v34 }
 0x47d   :  { %4080 = vmatmul.mubr.msk.f32.vlgmr.msra.gmra.mxu1 %vm198_vm2, %v456_v39 }
 0x47e   :  { %4088 = vmatpush3.msra.mxu1 %v625_v20  ;;  %4089 = vmatprep.mubr.msk.f32.mxu1 %vm4448_vm1, %v4447_v34 }
 0x47f   :  { %4097 = vmatprep.subr.mxu1 %v4447_v34 }
 0x49d   :  { %v621_v30 = vpop.xlane.xlu0 %620 }
 0x49e   :  { %4357 = vrcp.f32 %v621_v30 }
 0x49f   :  { %4359 = vrcp.f32 %v788_v29 }
 0x4a1   :  { %v975_v32 = vpop.xlane.xlu0 %974 }
 0x4a2   :  { %4361 = vrcp.f32 %v975_v32 }
 0x4a5   :  { %v1309_v36 = vpop.xlane.xlu0 %1308 }
 0x4a9   :  { %v1142_v37 = vpop.xlane.xlu1 %1141 }
 0x4aa   :  { %4363 = vrcp.f32 %v1142_v37 }
 0x4ab   :  { %v4358_v40 = vpop.eup %4357  ;;  %4365 = vrcp.f32 %v1309_v36 }
 0x4ac   :  { %v623_v41 = vmul.f32 %v4358_v40, %v4344_v38  ;;  %v4360_v42 = vpop.eup %4359 }
 0x4ad   :  { %v790_v43 = vmul.f32 %v4360_v42, %v4709_v59  ;;  %v1480_v52 = vpop.permute.xlu1 %1479 }
 0x4ae   :  { %4090 = vmatmul.mubr.msk.f32.vlgmr.msra.gmra.mxu1 %vm198_vm2, %v623_v41 }
 0x4af   :  { %4098 = vmatpush3.msra.mxu1 %v792_v21  ;;  %4099 = vmatprep.mubr.msk.f32.mxu1 %vm4448_vm1, %v4447_v34  ;;  %v4362_v44 = vpop.eup %4361 }
 0x4b0   :  { %4107 = vmatprep.subr.mxu1 %v4447_v34  ;;  %v977_v46 = vmul.f32 %v4362_v44, %v4720_v8 }
 0x4b1   :  { %v1476_v45 = vpop.xlane.xlu0 %1475 }
 0x4b2   :  { %4367 = vrcp.f32 %v1476_v45  ;;  %4100 = vmatmul.mubr.msk.f32.vlgmr.msra.gmra.mxu1 %vm198_vm2, %v790_v43 }
 0x4b3   :  { %4108 = vmatpush3.msra.mxu1 %v979_v22  ;;  %4109 = vmatprep.mubr.msk.f32.mxu1 %vm4448_vm1, %v4447_v34 }
 0x4b4   :  { %4117 = vmatprep.subr.mxu1 %v4447_v34 }
 0x4b5   :  { %v1313_v50 = vpop.permute.xlu0 %1312 }
 0x4b6   :  { %4110 = vmatmul.mubr.msk.f32.vlgmr.msra.gmra.mxu1 %vm198_vm2, %v977_v46  ;;  %v1710_v46 = vld [vmem:[%s5173_s10 + $0x10] sm:$0xff] }
 0x4b7   :  { %v4364_v47 = vpop.eup %4363  ;;  %4118 = vmatpush3.msra.mxu1 %v1146_v35  ;;  %4119 = vmatprep.mubr.msk.f32.mxu1 %vm4448_vm1, %v4447_v34 }
 0x4b8   :  { %4127 = vmatprep.subr.mxu1 %v4447_v34  ;;  %v1144_v48 = vmul.f32 %v4364_v47, %v4350_v16  ;;  %v4366_v49 = vpop.eup %4365  ;;  %v1709_v47 = vld [vmem:[%s5173_s10 + $0x8] sm:$0xff] }
 0x4b9   :  { %v1311_v51 = vmul.f32 %v4366_v49, %v4724_v13 }
 0x4ba   :  { %4120 = vmatmul.mubr.msk.f32.vlgmr.msra.gmra.mxu1 %vm198_vm2, %v1144_v48  ;;  %v1708_v48 = vld [vmem:[%s5173_s10] sm:$0xff] }
 0x4bb   :  { %4128 = vmatpush3.msra.mxu1 %v1313_v50  ;;  %4129 = vmatprep.mubr.msk.f32.mxu1 %vm4448_vm1, %v4447_v34 }
 0x4bc   :  { %4137 = vmatprep.subr.mxu1 %v4447_v34 }
 0x4be   :  { %4130 = vmatmul.mubr.msk.f32.vlgmr.msra.gmra.mxu1 %vm198_vm2, %v1311_v51 }
 0x4bf   :  { %v4368_v53 = vpop.eup %4367  ;;  %4138 = vmatpush3.msra.mxu1 %v1480_v52  ;;  %4139 = vmatprep.mubr.msk.f32.mxu1 %vm4448_vm1, %v4447_v34 }
 0x4c0   :  { %v1478_v54 = vmul.f32 %v4368_v53, %v4729_v18 }
 0x4c2   :  { %4140 = vmatmul.mubr.msk.f32.vlgmr.msra.gmra.mxu1 %vm198_vm2, %v1478_v54 }
 0x539   :  { %v362_v55 = vpop.f32.mrf.mxu1 }
 0x53b   :  { %v4071_v56 = vpop.f32.mrf.mxu1 }
 0x53c   :  { %v3853_v56 = vld [vmem:[%s5171_s8] ss:$0 sm:$0xff] }
 0x53d   :  { %v529_v57 = vpop.f32.mrf.mxu1 }
 0x53e   :  { %868 = vrot.lane.b32.xlu0 %v529_v57, %s4460_s20 }
 0x53f   :  { %v4081_v59 = vpop.f32.mrf.mxu1 }
 0x540   :  { %v3854_v59 = vld [vmem:[%s5172_s9] ss:$0 sm:$0xff] }
 0x56e   :  { %v696_v60 = vpop.f32.mrf.mxu1 }
 0x56f   :  { %872 = vrot.lane.b32.xlu1 %v696_v60, %s5187_s30 }
 0x570   :  { %v4091_v63 = vpop.f32.mrf.mxu1 }
 0x572   :  { %v863_v0 = vpop.f32.mrf.mxu1 }
 0x573   :  { %876 = vrot.lane.b32.xlu1 %v863_v0, %s5185_s22 }
 0x574   :  { %v4101_v3 = vpop.f32.mrf.mxu1 }
 0x575   :  { %v1816_v3 = vld [vmem:[%s5175_s12 + $0x30] sm:$0xff] }
 0x576   :  { %v1050_v4 = vpop.f32.mrf.mxu1 }
 0x578   :  { %v4111_v5 = vpop.f32.mrf.mxu1 }
 0x579   :  { %v1814_v5 = vld [vmem:[%s5175_s12 + $0x20] sm:$0xff] }
 0x57a   :  { %v1217_v6 = vpop.f32.mrf.mxu1 }
 0x57b   :  { %1556 = vrot.lane.b32.xlu0 %v1217_v6, %s4460_s20  ;;  %v1813_v6 = vld [vmem:[%s5175_s12 + $0x18] sm:$0xff] }
 0x57c   :  { %v4121_v38 = vpop.f32.mrf.mxu1 }
 0x57d   :  { %v1812_v38 = vld [vmem:[%s5175_s12 + $0x10] sm:$0xff] }
 0x57e   :  { %v1384_v7 = vpop.f32.mrf.mxu1 }
 0x57f   :  { %1560 = vrot.lane.b32.xlu0 %v1384_v7, %s5187_s30  ;;  %v1811_v7 = vld [vmem:[%s5175_s12 + $0x8] sm:$0xff] }
 0x580   :  { %v4131_v8 = vpop.f32.mrf.mxu1 }
 0x581   :  { %v1810_v8 = vld [vmem:[%s5175_s12] sm:$0xff] }
 0x582   :  { %v1551_v9 = vpop.f32.mrf.mxu1 }
 0x583   :  { %1564 = vrot.lane.b32.xlu1 %v1551_v9, %s5185_s22  ;;  %v3855_v9 = vld [vmem:[%s5174_s11] ss:$0 sm:$0xff] }
 0x584   :  { %v4141_v10 = vpop.f32.mrf.mxu1 }
 0x5b0   :  { %v869_v11 = vpop.permute.xlu0 %868 }
 0x5b1   :  { %v879_v13 = vsel %vm198_vm2, %v362_v55, %v869_v11 }
 0x5e1   :  { %v873_v12 = vpop.permute.xlu1 %872 }
 0x5e2   :  { %v881_v14 = vsel %vm880_vm3, %v879_v13, %v873_v12 }
 0x5e5   :  { %v877_v16 = vpop.permute.xlu1 %876 }
 0x5e6   :  { %v883_v17 = vsel %vm882_vm4, %v881_v14, %v877_v16 }
 0x5e7   :  { %4150 = vmatprep.mubr.msk.f32.mxu0 %vm58_vm0, %v883_v17 }
 0x5ed   :  { %v1557_v18 = vpop.permute.xlu0 %1556 }
 0x5ee   :  { %v1567_v20 = vsel %vm198_vm2, %v1050_v4, %v1557_v18  ;;  %v1815_v4 = vld [vmem:[%s5175_s12 + $0x28] sm:$0xff] }
 0x5f1   :  { %v1561_v19 = vpop.permute.xlu0 %1560 }
 0x5f2   :  { %v1568_v21 = vsel %vm880_vm3, %v1567_v20, %v1561_v19 }
 0x5f5   :  { %v1565_v22 = vpop.permute.xlu1 %1564 }
 0x5f6   :  { %v1569_v23 = vsel %vm882_vm4, %v1568_v21, %v1565_v22 }
 0x5f7   :  { %4151 = vmatmul.mubr.msk.f32.vlgmr.msra.gmra.mxu0 %vm58_vm0, %v1569_v23 }
 0x5f8   :  { %4165 = vmatpush3.msra.mxu0 %v1817_v2 }
 0x5f9   :  { %4166 = vmatprep.subr.mxu0 %v1816_v3 }
 0x5fa   :  { %4167 = vmatpush3.msra.mxu0 %v1816_v3 }
 0x5fb   :  { %4168 = vmatprep.subr.mxu0 %v1815_v4 }
 0x5fc   :  { %4169 = vmatpush3.msra.mxu0 %v1815_v4  ;;  %v3868_v4 = vld [vmem:[%s5168_s5 + $0x1] ss:$0 sm:$0xff]  ;;  %s5191_s5 = smov 40  }
 0x5fd   :  { %4170 = vmatprep.subr.mxu0 %v1814_v5 }
 0x5fe   :  { %4171 = vmatpush3.msra.mxu0 %v1814_v5 }
 0x5ff   :  { %4172 = vmatprep.subr.mxu0 %v1813_v6 }
 0x600   :  { %4173 = vmatpush3.msra.mxu0 %v1813_v6 }
 0x601   :  { %4174 = vmatprep.subr.mxu0 %v1812_v38 }
 0x602   :  { %4175 = vmatpush3.msra.mxu0 %v1812_v38 }
 0x603   :  { %4176 = vmatprep.subr.mxu0 %v1811_v7 }
 0x604   :  { %4177 = vmatpush3.msra.mxu0 %v1811_v7 }
 0x605   :  { %4178 = vmatprep.subr.mxu0 %v1810_v8 }
 0x606   :  { %4179 = vmatpush3.msra.mxu0 %v1810_v8 }
 0x607   :  { %4204 = vmatprep.subr.mxu0 %v4447_v34 }
 0x6b7   :  { %v4152_v25 = vpop.f32.mrf.mxu0 }
 0x6b8   :  { %v1659_v26 = vadd.f32 %v4152_v25, %v3850_v24  ;;  %v3858_v25 = vld [vmem:[%s5176_s13] ss:$0 sm:$0xff] }
 0x6b9   :  { %v1653_v27 = vpop.f32.mrf.mxu0 }
 0x6ba   :  { %v1654_v28 = vadd.f32 %v3850_v24, %v1653_v27  ;;  %v1663_v39 = vadd.f32 %v1659_v26, %v4582_v33 }
 0x6bc   :  { %v1669_v29 = vsel %vm58_vm0, %v1663_v39, 0.0  ;;  %v1662_v30 = vadd.f32 %v1654_v28, %v4578_v31  ;;  %v1711_v31 = vld [vmem:[%s5173_s10 + $0x18] sm:$0xff] }
 0x6bd   :  { %1670 = vadd.xlane.f32.xlu1 %v1669_v29  ;;  %4153 = vmatprep.subr.mxu1 %v1711_v31 }
 0x6be   :  { %v1666_v32 = vsel %vm58_vm0, %v1662_v30, 0.0  ;;  %4154 = vmatpush3.msra.mxu1 %v1711_v31 }
 0x6bf   :  { %1667 = vadd.xlane.f32.xlu0 %v1666_v32  ;;  %4155 = vmatprep.subr.mxu1 %v1710_v46 }
 0x6c0   :  { %4156 = vmatpush3.msra.mxu1 %v1710_v46  ;;  %v3866_v46 = vld [vmem:[%s5167_s4 + $0x38] sm:$0xff] }
 0x6c1   :  { %4157 = vmatprep.subr.mxu1 %v1709_v47 }
 0x6c2   :  { %4158 = vmatpush3.msra.mxu1 %v1709_v47  ;;  %v3865_v47 = vld [vmem:[%s5167_s4 + $0x30] sm:$0xff] }
 0x6c3   :  { %4159 = vmatprep.subr.mxu1 %v1708_v48 }
 0x6c4   :  { %4160 = vmatpush3.msra.mxu1 %v1708_v48  ;;  %v3864_v48 = vld [vmem:[%s5167_s4 + $0x28] sm:$0xff] }
 0x6c5   :  { %4183 = vmatprep.subr.mxu1 %v3866_v46 }
 0x746   :  { %v1671_v35 = vpop.xlane.xlu1 %1670 }
 0x747   :  { %v1673_v36 = vmul.f32 0.03125, %v1671_v35 }
 0x748   :  { %v1668_v37 = vpop.xlane.xlu0 %1667 }
 0x749   :  { %v1672_v40 = vmul.f32 0.03125, %v1668_v37  ;;  %v1675_v41 = vsub.f32 %v1663_v39, %v1673_v36 }
 0x74b   :  { %v1674_v42 = vsub.f32 %v1662_v30, %v1672_v40  ;;  %v1677_v45 = vmul.f32 %v1675_v41, %v1675_v41 }
 0x74d   :  { %v1676_v43 = vmul.f32 %v1674_v42, %v1674_v42  ;;  %v1681_v33 = vsel %vm58_vm0, %v1677_v45, 0.0 }
 0x74f   :  { %v1678_v44 = vsel %vm58_vm0, %v1676_v43, 0.0 }
 0x750   :  { %1679 = vadd.xlane.f32.xlu0 %v1678_v44 }
 0x754   :  { %1682 = vadd.xlane.f32.xlu0 %v1681_v33 }
 0x7d9   :  { %v1680_v49 = vpop.xlane.xlu0 %1679 }
 0x7da   :  { %v1684_v50 = vmul.f32 0.03125, %v1680_v49  ;;  %v3863_v49 = vld [vmem:[%s5167_s4 + $0x20] sm:$0xff] }
 0x7dc   :  { %v1686_v51 = vadd.f32 1e-05, %v1684_v50 }
 0x7dd   :  { %v1683_v52 = vpop.xlane.xlu0 %1682 }
 0x7de   :  { %4369 = vrsqrt.f32 %v1686_v51  ;;  %v1685_v53 = vmul.f32 0.03125, %v1683_v52 }
 0x7e0   :  { %v1687_v54 = vadd.f32 1e-05, %v1685_v53 }
 0x7e2   :  { %4371 = vrsqrt.f32 %v1687_v54 }
 0x7eb   :  { %v4370_v55 = vpop.eup %4369 }
 0x7ec   :  { %v1690_v57 = vmul.f32 %v4370_v55, %v1674_v42 }
 0x7ee   :  { %v1698_v60 = vmul.f32 %v3853_v56, %v1690_v57  ;;  %v3861_v57 = vld [vmem:[%s5177_s14] ss:$0 sm:$0xff] }
 0x7ef   :  { %v4372_v61 = vpop.eup %4371 }
 0x7f0   :  { %v1691_v62 = vmul.f32 %v4372_v61, %v1675_v41  ;;  %v1706_v63 = vadd.f32 %v3854_v59, %v1698_v60 }
 0x7f2   :  { %v1699_v0 = vmul.f32 %v3853_v56, %v1691_v62  ;;  %4161 = vmatprep.mubr.msk.f32.mxu1 %vm58_vm0, %v1706_v63 }
 0x7f4   :  { %v1707_v1 = vadd.f32 %v3854_v59, %v1699_v0 }
 0x7f6   :  { %4162 = vmatmul.mubr.msk.f32.vlgmr.msra.gmra.mxu1 %vm58_vm0, %v1707_v1 }
 0x7f7   :  { %4184 = vmatpush3.msra.mxu1 %v3866_v46 }
 0x7f8   :  { %4185 = vmatprep.subr.mxu1 %v3865_v47 }
 0x7f9   :  { %4186 = vmatpush3.msra.mxu1 %v3865_v47 }
 0x7fa   :  { %4187 = vmatprep.subr.mxu1 %v3864_v48 }
 0x7fb   :  { %4188 = vmatpush3.msra.mxu1 %v3864_v48 }
 0x7fc   :  { %4189 = vmatprep.subr.mxu1 %v3863_v49 }
 0x7fd   :  { %4190 = vmatpush3.msra.mxu1 %v3863_v49 }
 0x7fe   :  { %4194 = vmatprep.subr.mxu1 %v4447_v34 }
 0x8b6   :  { %v4163_v10 = vpop.f32.mrf.mxu1 }
 0x8b7   :  { %v1797_v11 = vadd.f32 %v4163_v10, %v3855_v9 }
 0x8b8   :  { %v1791_v12 = vpop.f32.mrf.mxu1 }
 0x8b9   :  { %v1803_v13 = vmul.f32 0.70710677, %v1797_v11  ;;  %v1792_v14 = vadd.f32 %v3855_v9, %v1791_v12  ;;  %v1801_v22 = vmul.f32 0.5, %v1797_v11 }
 0x8bb   :  { %4373 = verf.f32 %v1803_v13  ;;  %v1802_v16 = vmul.f32 0.70710677, %v1792_v14  ;;  %v1800_v20 = vmul.f32 0.5, %v1792_v14 }
 0x8bd   :  { %4375 = verf.f32 %v1802_v16 }
 0x8c8   :  { %v4374_v17 = vpop.eup %4373 }
 0x8c9   :  { %v1807_v19 = vadd.f32 1.0, %v4374_v17 }
 0x8ca   :  { %v4376_v18 = vpop.eup %4375 }
 0x8cb   :  { %v1806_v21 = vadd.f32 1.0, %v4376_v18  ;;  %v1809_v24 = vmul.f32 %v1807_v19, %v1801_v22 }
 0x8cd   :  { %v1808_v23 = vmul.f32 %v1806_v21, %v1800_v20 }
 0x8cf   :  { %4180 = vmatprep.mubr.msk.f32.mxu0 %vm1825_vm5, %v1808_v23 }
 0x8d0   :  { %4181 = vmatmul.mubr.msk.f32.vlgmr.msra.gmra.mxu0 %vm1825_vm5, %v1809_v24 }
 0x8d1   :  { %4206 = vmatprep.mubr.msk.f32.mxu0 %vm4448_vm1, %v4447_v34 }
 0x990   :  { %v4182_v26 = vpop.f32.mrf.mxu0 }
 0x991   :  { %v1904_v27 = vadd.f32 %v4182_v26, %v3858_v25 }
 0x992   :  { %v1898_v28 = vpop.f32.mrf.mxu0 }
 0x993   :  { %v1899_v39 = vadd.f32 %v3858_v25, %v1898_v28  ;;  %v1908_v29 = vadd.f32 %v1904_v27, %v1707_v1 }
 0x995   :  { %v1914_v30 = vsel %vm58_vm0, %v1908_v29, 0.0  ;;  %v1907_v32 = vadd.f32 %v1899_v39, %v1706_v63  ;;  %v3862_v63 = vld [vmem:[%s5178_s15] ss:$0 sm:$0xff] }
 0x996   :  { %1915 = vadd.xlane.f32.xlu1 %v1914_v30 }
 0x997   :  { %v1911_v35 = vsel %vm58_vm0, %v1907_v32, 0.0 }
 0x998   :  { %1912 = vadd.xlane.f32.xlu0 %v1911_v35 }
 0xa1f   :  { %v1916_v36 = vpop.xlane.xlu1 %1915 }
 0xa20   :  { %v1918_v37 = vmul.f32 0.03125, %v1916_v36 }
 0xa21   :  { %v1913_v40 = vpop.xlane.xlu0 %1912 }
 0xa22   :  { %v1920_v41 = vsub.f32 %v1908_v29, %v1918_v37  ;;  %v1917_v42 = vmul.f32 0.03125, %v1913_v40 }
 0xa24   :  { %v1919_v43 = vsub.f32 %v1907_v32, %v1917_v42  ;;  %v1922_v44 = vmul.f32 %v1920_v41, %v1920_v41 }
 0xa26   :  { %v1926_v45 = vsel %vm58_vm0, %v1922_v44, 0.0  ;;  %v1921_v33 = vmul.f32 %v1919_v43, %v1919_v43 }
 0xa27   :  { %1927 = vadd.xlane.f32.xlu1 %v1926_v45 }
 0xa28   :  { %v1923_v31 = vsel %vm58_vm0, %v1921_v33, 0.0 }
 0xa29   :  { %1924 = vadd.xlane.f32.xlu0 %v1923_v31 }
 0xab0   :  { %v1928_v50 = vpop.xlane.xlu1 %1927 }
 0xab1   :  { %v1930_v51 = vmul.f32 0.03125, %v1928_v50 }
 0xab2   :  { %v1925_v52 = vpop.xlane.xlu0 %1924 }
 0xab3   :  { %v1932_v53 = vadd.f32 1e-05, %v1930_v51  ;;  %v1929_v54 = vmul.f32 0.03125, %v1925_v52 }
 0xab5   :  { %4377 = vrsqrt.f32 %v1932_v53  ;;  %v1931_v55 = vadd.f32 1e-05, %v1929_v54 }
 0xab7   :  { %4379 = vrsqrt.f32 %v1931_v55 }
 0xac2   :  { %v4378_v56 = vpop.eup %4377 }
 0xac3   :  { %v1936_v59 = vmul.f32 %v4378_v56, %v1920_v41 }
 0xac4   :  { %v4380_v60 = vpop.eup %4379 }
 0xac5   :  { %v1935_v61 = vmul.f32 %v4380_v60, %v1919_v43  ;;  %v1944_v62 = vmul.f32 %v3861_v57, %v1936_v59 }
 0xac7   :  { %v1943_v0 = vmul.f32 %v3861_v57, %v1935_v61  ;;  %v4885_v2 = vadd.f32 %v3862_v63, %v1944_v62 }
 0xac9   :  { %v4883_v1 = vadd.f32 %v3862_v63, %v1943_v0 }
 0xacb   :  { %4191 = vmatprep.mubr.msk.f32.mxu1 %vm58_vm0, %v4883_v1 }
 0xacc   :  { %4192 = vmatmul.mubr.msk.f32.vlgmr.msra.gmra.mxu1 %vm58_vm0, %v4885_v2 }
 0xacd   :  { %4196 = vmatprep.mubr.msk.f32.mxu1 %vm4448_vm1, %v4447_v34 }
 0xb8c   :  { %v4193_v3 = vpop.f32.mrf.mxu1 }
 0xb8d   :  { %v4910_v38 = vadd.f32 %v4193_v3, %v3868_v4 }
 0xb8e   :  { %v2038_v5 = vpop.f32.mrf.mxu1 }
 0xb8f   :  { %v4896_v6 = vadd.f32 %v3868_v4, %v2038_v5 }
 0xb91   :  { %2215 = vrot.lane.b32.xlu1 %v4896_v6, %s4449_s23  ;;  %2048 = vrot.lane.b32.xlu0 %v4896_v6, %s4450_s24 }
 0xb95   :  { %2213 = vrot.lane.b32.xlu1 %v4896_v6, %s4451_s25  ;;  %2380 = vrot.lane.b32.xlu0 %v4896_v6, %s4452_s26 }
 0xb99   :  { %2382 = vrot.lane.b32.xlu1 %v4896_v6, %s4453_s27  ;;  %2547 = vrot.lane.b32.xlu0 %v4896_v6, %s4454_s28 }
 0xb9d   :  { %2549 = vrot.lane.b32.xlu1 %v4896_v6, %s4455_s29  ;;  %2897 = vrot.lane.b32.xlu0 %v4910_v38, %s4449_s23  ;;  %s5192_s23 = smov 56  }
 0xba1   :  { %2730 = vrot.lane.b32.xlu1 %v4910_v38, %s4450_s24  ;;  %3064 = vrot.lane.b32.xlu0 %v4910_v38, %s4453_s27  ;;  %s4463_s24 = smov [#allocation2]  }
 0xba5   :  { %2895 = vrot.lane.b32.xlu1 %v4910_v38, %s4451_s25  ;;  %3231 = vrot.lane.b32.xlu0 %v4910_v38, %s4455_s29  ;;  %s3810_s25 = sshll.u32 %s4463_s24, 4  ;;  %s3811_s25 = int_to_ptr.vmem [resolvable:$true] %s3810_s25 }
 0xba6   :  { %p4430_p1 = scmp.lt.s32.totalorder %s3811_s25, %s3811_s25 }
 0xba9   :  { %3062 = vrot.lane.b32.xlu1 %v4910_v38, %s4452_s26  ;;  %s4425_s26 = scalar_lea.vmem %s3811_s25, 256 }
 0xbaa   :  { %p4426_p0 = scmp.ne.s32.totalorder %s3811_s25, %s4425_s26  ;;  %p4431_p2 = scmp.lt.s32.totalorder %s4425_s26, %s4425_s26 }
 0xbac   :  { %p4432_p3 = por %p4431_p2, %p4430_p1 }
 0xbad   :  { %3229 = vrot.lane.b32.xlu1 %v4910_v38, %s4454_s28  ;;  %s5193_s28 = smov 16  }
 0xbae   :  { %p4433_p4 = pnand %p4432_p3, %p4426_p0 }
 0xc03   :  { %v2216_v7 = vpop.permute.xlu1 %2215  ;;  %v2049_v8 = vpop.permute.xlu0 %2048 }
 0xc04   :  { %4195 = vmatpush3.xpose.msk.msra.mxu1 %vm198_vm2, %v2049_v8  ;;  %4205 = vmatpush3.xpose.msk.msra.mxu0 %vm198_vm2, %v2216_v7 }
 0xc05   :  { %4214 = vmatprep.subr.mxu0 %v4447_v34  ;;  %4199 = vmatprep.subr.mxu1 %v4447_v34 }
 0xc07   :  { %v2214_v9 = vpop.permute.xlu1 %2213  ;;  %4197 = vmatmul.mubr.msk.f32.vlgmr.msra.gmra.mxu1 %vm198_vm2, %v4896_v6  ;;  %v2381_v10 = vpop.permute.xlu0 %2380 }
 0xc08   :  { %4207 = vmatmul.mubr.msk.f32.vlgmr.msra.gmra.mxu0 %vm198_vm2, %v2214_v9  ;;  %4201 = vmatprep.mubr.msk.f32.mxu1 %vm4448_vm1, %v4447_v34 }
 0xc09   :  { %4216 = vmatprep.mubr.msk.f32.mxu0 %vm4448_vm1, %v4447_v34 }
 0xc0b   :  { %v2383_v11 = vpop.permute.xlu1 %2382  ;;  %v2548_v12 = vpop.permute.xlu0 %2547 }
 0xc0c   :  { %4215 = vmatpush3.xpose.msk.msra.mxu0 %vm198_vm2, %v2383_v11 }
 0xc0d   :  { %4224 = vmatprep.subr.mxu0 %v4447_v34 }
 0xc0f   :  { %v2550_v13 = vpop.permute.xlu1 %2549  ;;  %4217 = vmatmul.mubr.msk.f32.vlgmr.msra.gmra.mxu0 %vm198_vm2, %v2381_v10  ;;  %v2898_v14 = vpop.permute.xlu0 %2897 }
 0xc10   :  { %4225 = vmatpush3.xpose.msk.msra.mxu0 %vm198_vm2, %v2550_v13  ;;  %4226 = vmatprep.mubr.msk.f32.mxu0 %vm4448_vm1, %v4447_v34 }
 0xc11   :  { %4234 = vmatprep.subr.mxu0 %v4447_v34 }
 0xc13   :  { %v2731_v16 = vpop.permute.xlu1 %2730  ;;  %4227 = vmatmul.mubr.msk.f32.vlgmr.msra.gmra.mxu0 %vm198_vm2, %v2548_v12  ;;  %v3065_v18 = vpop.permute.xlu0 %3064 }
 0xc14   :  { %4235 = vmatpush3.xpose.msk.msra.mxu0 %vm198_vm2, %v2731_v16  ;;  %4236 = vmatprep.mubr.msk.f32.mxu0 %vm4448_vm1, %v4447_v34 }
 0xc15   :  { %4244 = vmatprep.subr.mxu0 %v4447_v34 }
 0xc17   :  { %v2896_v17 = vpop.permute.xlu1 %2895  ;;  %4237 = vmatmul.mubr.msk.f32.vlgmr.msra.gmra.mxu0 %vm198_vm2, %v4910_v38  ;;  %v3232_v20 = vpop.permute.xlu0 %3231 }
 0xc18   :  { %4245 = vmatpush3.xpose.msk.msra.mxu0 %vm198_vm2, %v2898_v14  ;;  %4246 = vmatprep.mubr.msk.f32.mxu0 %vm4448_vm1, %v4447_v34 }
 0xc19   :  { %4254 = vmatprep.subr.mxu0 %v4447_v34 }
 0xc1b   :  { %4247 = vmatmul.mubr.msk.f32.vlgmr.msra.gmra.mxu0 %vm198_vm2, %v2896_v17  ;;  %v3063_v19 = vpop.permute.xlu1 %3062 }
 0xc1c   :  { %4255 = vmatpush3.xpose.msk.msra.mxu0 %vm198_vm2, %v3065_v18  ;;  %4256 = vmatprep.mubr.msk.f32.mxu0 %vm4448_vm1, %v4447_v34 }
 0xc1d   :  { %4264 = vmatprep.subr.mxu0 %v4447_v34 }
 0xc1f   :  { %4257 = vmatmul.mubr.msk.f32.vlgmr.msra.gmra.mxu0 %vm198_vm2, %v3063_v19  ;;  %v3230_v21 = vpop.permute.xlu1 %3229 }
 0xc20   :  { %4265 = vmatpush3.xpose.msk.msra.mxu0 %vm198_vm2, %v3232_v20  ;;  %4266 = vmatprep.mubr.msk.f32.mxu0 %vm4448_vm1, %v4447_v34 }
 0xc23   :  { %4267 = vmatmul.mubr.msk.f32.vlgmr.msra.gmra.mxu0 %vm198_vm2, %v3230_v21 }
 0xcc7   :  { %v2120_v22 = vpop.f32.mrf.mxu1 }
 0xcc8   :  { %v2124_v23 = vmul.f32 0.35355338, %v2120_v22  ;;  %v2287_v24 = vpop.f32.mrf.mxu0 }
 0xcc9   :  { %v2291_v25 = vmul.f32 0.35355338, %v2287_v24  ;;  %v4198_v26 = vpop.f32.mrf.mxu1 }
 0xcca   :  { %v4208_v27 = vpop.f32.mrf.mxu0  ;;  %v2125_v28 = vadd.f32 %v2124_v23, %v4669_v58 }
 0xccb   :  { %v2292_v39 = vadd.f32 %v2291_v25, %v4669_v58 }
 0xccc   :  { %v2126_v29 = vsel %vm198_vm2, %v2125_v28, -inf }
 0xccd   :  { %2127 = vmax.xlane.f32.xlu0 %v2126_v29  ;;  %v2293_v30 = vsel %vm198_vm2, %v2292_v39, -inf }
 0xcce   :  { %2294 = vmax.xlane.f32.xlu1 %v2293_v30 }
 0xccf   :  { %v2454_v32 = vpop.f32.mrf.mxu0 }
 0xcd0   :  { %v2458_v35 = vmul.f32 0.35355338, %v2454_v32 }
 0xcd1   :  { %v4218_v36 = vpop.f32.mrf.mxu0 }
 0xcd2   :  { %v4972_v37 = vadd.f32 %v2458_v35, %v4669_v58 }
 0xcd3   :  { %v2621_v40 = vpop.f32.mrf.mxu0 }
 0xcd4   :  { %v2625_v41 = vmul.f32 0.35355338, %v2621_v40  ;;  %v2460_v42 = vsel %vm198_vm2, %v4972_v37, -inf }
 0xcd5   :  { %2461 = vmax.xlane.f32.xlu0 %v2460_v42  ;;  %v4228_v43 = vpop.f32.mrf.mxu0 }
 0xcd6   :  { %v2626_v44 = vadd.f32 %v2625_v41, %v4669_v58 }
 0xcd7   :  { %v2802_v45 = vpop.f32.mrf.mxu0 }
 0xcd8   :  { %v2806_v33 = vmul.f32 0.35355338, %v2802_v45  ;;  %v2627_v31 = vsel %vm198_vm2, %v2626_v44, -inf }
 0xcd9   :  { %2628 = vmax.xlane.f32.xlu0 %v2627_v31  ;;  %v4238_v46 = vpop.f32.mrf.mxu0 }
 0xcda   :  { %v2807_v47 = vadd.f32 %v2806_v33, %v4681_v15 }
 0xcdb   :  { %v2969_v48 = vpop.f32.mrf.mxu0 }
 0xcdc   :  { %v2973_v49 = vmul.f32 0.35355338, %v2969_v48  ;;  %v2808_v50 = vsel %vm198_vm2, %v2807_v47, -inf }
 0xcdd   :  { %2809 = vmax.xlane.f32.xlu0 %v2808_v50  ;;  %v4248_v51 = vpop.f32.mrf.mxu0 }
 0xcde   :  { %v2974_v52 = vadd.f32 %v2973_v49, %v4681_v15 }
 0xcdf   :  { %v3136_v53 = vpop.f32.mrf.mxu0 }
 0xce0   :  { %v3140_v54 = vmul.f32 0.35355338, %v3136_v53  ;;  %v2975_v58 = vsel %vm198_vm2, %v2974_v52, -inf }
 0xce1   :  { %2976 = vmax.xlane.f32.xlu1 %v2975_v58  ;;  %v4258_v55 = vpop.f32.mrf.mxu0 }
 0xce2   :  { %v3141_v56 = vadd.f32 %v3140_v54, %v4681_v15 }
 0xce3   :  { %v3303_v57 = vpop.f32.mrf.mxu0 }
 0xce4   :  { %v3142_v59 = vsel %vm198_vm2, %v3141_v56, -inf  ;;  %v3307_v61 = vmul.f32 0.35355338, %v3303_v57 }
 0xce5   :  { %3143 = vmax.xlane.f32.xlu0 %v3142_v59  ;;  %v4268_v60 = vpop.f32.mrf.mxu0 }
 0xce6   :  { %v3308_v62 = vadd.f32 %v3307_v61, %v4681_v15 }
 0xce8   :  { %v3309_v63 = vsel %vm198_vm2, %v3308_v62, -inf }
 0xcf2   :  { %2137 = vrot.lane.b32.xlu1 %v4896_v6, %s4456_s1 }
 0xd16   :  { %3310 = vmax.xlane.f32.xlu1 %v3309_v63 }
 0xd27   :  { %2471 = vrot.lane.b32.xlu1 %v4896_v6, %s4457_s17 }
 0xd2b   :  { %2638 = vrot.lane.b32.xlu1 %v4896_v6, %s5191_s5 }
 0xd2f   :  { %2819 = vrot.lane.b32.xlu1 %v4910_v38, %s4456_s1 }
 0xd56   :  { %v2128_v0 = vpop.xlane.xlu0 %2127 }
 0xd57   :  { %v2129_v3 = vsub.f32 %v2125_v28, %v2128_v0  ;;  %v2295_v4 = vpop.xlane.xlu1 %2294 }
 0xd58   :  { %v2296_v5 = vsub.f32 %v2292_v39, %v2295_v4 }
 0xd59   :  { %v2130_v7 = vmul.f32 1.442695, %v2129_v3 }
 0xd5a   :  { %v2297_v8 = vmul.f32 1.442695, %v2296_v5 }
 0xd5b   :  { %4381 = vpow2.f32 %v2130_v7 }
 0xd5c   :  { %4383 = vpow2.f32 %v2297_v8 }
 0xd5e   :  { %v2462_v15 = vpop.xlane.xlu0 %2461 }
 0xd5f   :  { %v2463_v21 = vsub.f32 %v4972_v37, %v2462_v15 }
 0xd61   :  { %v2464_v23 = vmul.f32 1.442695, %v2463_v21 }
 0xd62   :  { %v2629_v9 = vpop.xlane.xlu0 %2628 }
 0xd63   :  { %v2630_v10 = vsub.f32 %v2626_v44, %v2629_v9 }
 0xd65   :  { %v2631_v11 = vmul.f32 1.442695, %v2630_v10 }
 0xd66   :  { %v2810_v22 = vpop.xlane.xlu0 %2809 }
 0xd67   :  { %4385 = vpow2.f32 %v2631_v11  ;;  %v2811_v24 = vsub.f32 %v2807_v47, %v2810_v22  ;;  %v3896_v22 = vld [vmem:[%s5169_s6 + $0x28] sm:$0xff] }
 0xd68   :  { %v4382_v12 = vpop.eup %4381  ;;  %4387 = vpow2.f32 %v2464_v23  ;;  %v3895_v23 = vld [vmem:[%s5169_s6 + $0x20] sm:$0xff] }
 0xd69   :  { %v4994_v13 = vpop.eup %4383  ;;  %v2132_v14 = vsel %vm198_vm2, %v4382_v12, 0.0  ;;  %v2812_v26 = vmul.f32 1.442695, %v2811_v24 }
 0xd6a   :  { %v2977_v16 = vpop.xlane.xlu1 %2976  ;;  %2133 = vadd.xlane.f32.xlu0 %v2132_v14  ;;  %v2299_v17 = vsel %vm198_vm2, %v4994_v13, 0.0 }
 0xd6b   :  { %2300 = vadd.xlane.f32.xlu1 %v2299_v17  ;;  %4389 = vpow2.f32 %v2812_v26  ;;  %v2978_v28 = vsub.f32 %v2974_v52, %v2977_v16 }
 0xd6d   :  { %v2979_v29 = vmul.f32 1.442695, %v2978_v28 }
 0xd6e   :  { %v2138_v18 = vpop.permute.xlu1 %2137  ;;  %v3144_v25 = vpop.xlane.xlu0 %3143 }
 0xd6f   :  { %4200 = vmatpush3.msra.mxu1 %v2138_v18  ;;  %v3145_v27 = vsub.f32 %v3141_v56, %v3144_v25 }
 0xd70   :  { %4209 = vmatprep.subr.mxu1 %v4447_v34 }
 0xd71   :  { %v3146_v39 = vmul.f32 1.442695, %v3145_v27 }
 0xd73   :  { %4391 = vpow2.f32 %v3146_v39 }
 0xd74   :  { %v5000_v19 = vpop.eup %4385  ;;  %4393 = vpow2.f32 %v2979_v29 }
 0xd75   :  { %v2633_v20 = vsel %vm198_vm2, %v5000_v19, 0.0  ;;  %v4388_v30 = vpop.eup %4387 }
 0xd76   :  { %2634 = vadd.xlane.f32.xlu1 %v2633_v20  ;;  %v3897_v20 = vld [vmem:[%s5169_s6 + $0x30] sm:$0xff] }
 0xd78   :  { %v5010_v32 = vpop.eup %4389 }
 0xd79   :  { %v2814_v40 = vsel %vm198_vm2, %v5010_v32, 0.0 }
 0xd80   :  { %2304 = vrot.lane.b32.xlu0 %v4896_v6, %s5192_s23  ;;  %v2466_v6 = vsel %vm198_vm2, %v4388_v30, 0.0  ;;  %v5014_v41 = vpop.eup %4391 }
 0xd81   :  { %v3148_v42 = vsel %vm198_vm2, %v5014_v41, 0.0  ;;  %v4394_v43 = vpop.eup %4393 }
 0xd82   :  { %v2981_v44 = vsel %vm198_vm2, %v4394_v43, 0.0 }
 0xd87   :  { %2986 = vrot.lane.b32.xlu1 %v4910_v38, %s5192_s23 }
 0xd9f   :  { %v3311_v35 = vpop.xlane.xlu1 %3310  ;;  %2467 = vadd.xlane.f32.xlu0 %v2466_v6 }
 0xda0   :  { %v3312_v36 = vsub.f32 %v3308_v62, %v3311_v35 }
 0xda2   :  { %v3313_v37 = vmul.f32 1.442695, %v3312_v36 }
 0xda3   :  { %2815 = vadd.xlane.f32.xlu0 %v2814_v40  ;;  %v2472_v31 = vpop.permute.xlu1 %2471 }
 0xda4   :  { %4395 = vpow2.f32 %v3313_v37 }
 0xda7   :  { %3149 = vadd.xlane.f32.xlu0 %v3148_v42  ;;  %v2639_v46 = vpop.permute.xlu1 %2638 }
 0xdab   :  { %2982 = vadd.xlane.f32.xlu1 %v2981_v44  ;;  %v2820_v47 = vpop.permute.xlu1 %2819 }
 0xdb1   :  { %v5019_v45 = vpop.eup %4395 }
 0xdb2   :  { %v3315_v33 = vsel %vm198_vm2, %v5019_v45, 0.0 }
 0xdb3   :  { %3316 = vadd.xlane.f32.xlu0 %v3315_v33 }
 0xdbc   :  { %3320 = vrot.lane.b32.xlu1 %v4910_v38, %s5191_s5 }
 0xdc9   :  { %3153 = vrot.lane.b32.xlu0 %v4910_v38, %s4457_s17 }
 0xdf3   :  { %v2134_v48 = vpop.xlane.xlu0 %2133 }
 0xdf4   :  { %4397 = vrcp.f32 %v2134_v48  ;;  %v2301_v49 = vpop.xlane.xlu1 %2300 }
 0xdf5   :  { %4399 = vrcp.f32 %v2301_v49 }
 0xdf7   :  { %v2305_v53 = vpop.permute.xlu0 %2304 }
 0xdff   :  { %v2635_v54 = vpop.xlane.xlu1 %2634 }
 0xe01   :  { %v4398_v50 = vpop.eup %4397 }
 0xe02   :  { %v2136_v51 = vmul.f32 %v4398_v50, %v4382_v12  ;;  %v4400_v52 = vpop.eup %4399 }
 0xe03   :  { %v2303_v38 = vmul.f32 %v4400_v52, %v4994_v13  ;;  %v2987_v56 = vpop.permute.xlu1 %2986 }
 0xe04   :  { %4202 = vmatmul.mubr.msk.f32.vlgmr.msra.gmra.mxu1 %vm198_vm2, %v2136_v51 }
 0xe05   :  { %4210 = vmatpush3.msra.mxu1 %v2305_v53  ;;  %4211 = vmatprep.mubr.msk.f32.mxu1 %vm4448_vm1, %v4447_v34 }
 0xe06   :  { %4219 = vmatprep.subr.mxu1 %v4447_v34 }
 0xe08   :  { %4212 = vmatmul.mubr.msk.f32.vlgmr.msra.gmra.mxu1 %vm198_vm2, %v2303_v38 }
 0xe09   :  { %4220 = vmatpush3.msra.mxu1 %v2472_v31  ;;  %4221 = vmatprep.mubr.msk.f32.mxu1 %vm4448_vm1, %v4447_v34 }
 0xe0a   :  { %4229 = vmatprep.subr.mxu1 %v4447_v34 }
 0xe28   :  { %v2468_v58 = vpop.xlane.xlu0 %2467 }
 0xe29   :  { %4401 = vrcp.f32 %v2468_v58 }
 0xe2a   :  { %4403 = vrcp.f32 %v2635_v54 }
 0xe2c   :  { %v2816_v55 = vpop.xlane.xlu0 %2815 }
 0xe2d   :  { %4405 = vrcp.f32 %v2816_v55 }
 0xe30   :  { %v3150_v57 = vpop.xlane.xlu0 %3149 }
 0xe34   :  { %v2983_v59 = vpop.xlane.xlu1 %2982 }
 0xe35   :  { %4407 = vrcp.f32 %v2983_v59 }
 0xe36   :  { %v4402_v60 = vpop.eup %4401  ;;  %4409 = vrcp.f32 %v3150_v57 }
 0xe37   :  { %v2470_v61 = vmul.f32 %v4402_v60, %v4388_v30  ;;  %v4404_v62 = vpop.eup %4403 }
 0xe38   :  { %v2637_v63 = vmul.f32 %v4404_v62, %v5000_v19  ;;  %v3321_v10 = vpop.permute.xlu1 %3320  ;;  %v3898_v19 = vld [vmem:[%s5169_s6 + $0x38] sm:$0xff] }
 0xe39   :  { %4222 = vmatmul.mubr.msk.f32.vlgmr.msra.gmra.mxu1 %vm198_vm2, %v2470_v61  ;;  %4274 = vmatprep.subr.mxu0 %v3898_v19 }
 0xe3a   :  { %4230 = vmatpush3.msra.mxu1 %v2639_v46  ;;  %4231 = vmatprep.mubr.msk.f32.mxu1 %vm4448_vm1, %v4447_v34  ;;  %v4406_v0 = vpop.eup %4405  ;;  %v3900_v46 = vld [vmem:[%s5170_s7 + $0x1] ss:$0 sm:$0xff] }
 0xe3b   :  { %4239 = vmatprep.subr.mxu1 %v4447_v34  ;;  %v2818_v4 = vmul.f32 %v4406_v0, %v5010_v32  ;;  %4275 = vmatpush3.msra.mxu0 %v3898_v19  ;;  %v3908_v0 = vld [vmem:[%s5173_s10 + $0x28] sm:$0xff] }
 0xe3c   :  { %v3317_v3 = vpop.xlane.xlu0 %3316  ;;  %4276 = vmatprep.subr.mxu0 %v3897_v20 }
 0xe3d   :  { %4411 = vrcp.f32 %v3317_v3  ;;  %4232 = vmatmul.mubr.msk.f32.vlgmr.msra.gmra.mxu1 %vm198_vm2, %v2637_v63  ;;  %4277 = vmatpush3.msra.mxu0 %v3897_v20  ;;  %v3909_v63 = vld [vmem:[%s5173_s10 + $0x30] sm:$0xff]  ;;  %v3907_v3 = vld [vmem:[%s5173_s10 + $0x20] sm:$0xff] }
 0xe3e   :  { %4240 = vmatpush3.msra.mxu1 %v2820_v47  ;;  %4241 = vmatprep.mubr.msk.f32.mxu1 %vm4448_vm1, %v4447_v34 }
 0xe3f   :  { %4249 = vmatprep.subr.mxu1 %v4447_v34  ;;  %4278 = vmatprep.subr.mxu0 %v3896_v22 }
 0xe40   :  { %v3154_v15 = vpop.permute.xlu0 %3153  ;;  %4279 = vmatpush3.msra.mxu0 %v3896_v22  ;;  %v3920_v22 = vld [vmem:[%s5175_s12 + $0x68] sm:$0xff] }
 0xe41   :  { %4242 = vmatmul.mubr.msk.f32.vlgmr.msra.gmra.mxu1 %vm198_vm2, %v2818_v4  ;;  %4280 = vmatprep.subr.mxu0 %v3895_v23 }
 0xe42   :  { %v4408_v5 = vpop.eup %4407  ;;  %4250 = vmatpush3.msra.mxu1 %v2987_v56  ;;  %4251 = vmatprep.mubr.msk.f32.mxu1 %vm4448_vm1, %v4447_v34 }
 0xe43   :  { %4259 = vmatprep.subr.mxu1 %v4447_v34  ;;  %v2985_v7 = vmul.f32 %v4408_v5, %v4394_v43  ;;  %v4410_v8 = vpop.eup %4409  ;;  %4281 = vmatpush3.msra.mxu0 %v3895_v23  ;;  %v3919_v23 = vld [vmem:[%s5175_s12 + $0x60] sm:$0xff] }
 0xe44   :  { %v3152_v9 = vmul.f32 %v4410_v8, %v5014_v41 }
 0xe45   :  { %4252 = vmatmul.mubr.msk.f32.vlgmr.msra.gmra.mxu1 %vm198_vm2, %v2985_v7 }
 0xe46   :  { %4260 = vmatpush3.msra.mxu1 %v3154_v15  ;;  %4261 = vmatprep.mubr.msk.f32.mxu1 %vm4448_vm1, %v4447_v34 }
 0xe47   :  { %4269 = vmatprep.subr.mxu1 %v4447_v34 }
 0xe49   :  { %4262 = vmatmul.mubr.msk.f32.vlgmr.msra.gmra.mxu1 %vm198_vm2, %v3152_v9 }
 0xe4a   :  { %v4412_v11 = vpop.eup %4411  ;;  %4270 = vmatpush3.msra.mxu1 %v3321_v10  ;;  %4271 = vmatprep.mubr.msk.f32.mxu1 %vm4448_vm1, %v4447_v34 }
 0xe4b   :  { %v3319_v12 = vmul.f32 %v4412_v11, %v5019_v45  ;;  %v3905_v11 = vld [vmem:[%s5171_s8 + $0x1] ss:$0 sm:$0xff] }
 0xe4d   :  { %4272 = vmatmul.mubr.msk.f32.vlgmr.msra.gmra.mxu1 %vm198_vm2, %v3319_v12 }
 0xec4   :  { %v2209_v13 = vpop.f32.mrf.mxu1 }
 0xec6   :  { %v4203_v14 = vpop.f32.mrf.mxu1 }
 0xec8   :  { %v2376_v16 = vpop.f32.mrf.mxu1 }
 0xec9   :  { %2715 = vrot.lane.b32.xlu0 %v2376_v16, %s4460_s20 }
 0xeca   :  { %v4213_v17 = vpop.f32.mrf.mxu1 }
 0xef9   :  { %v2543_v18 = vpop.f32.mrf.mxu1 }
 0xefa   :  { %2719 = vrot.lane.b32.xlu1 %v2543_v18, %s5193_s28 }
 0xefb   :  { %v4223_v34 = vpop.f32.mrf.mxu1 }
 0xefc   :  { %v3922_v34 = vld [vmem:[%s5175_s12 + $0x78] sm:$0xff] }
 0xefd   :  { %v2710_v21 = vpop.f32.mrf.mxu1  ;;  %4296 = vmatprep.subr.mxu0 %v3922_v34 }
 0xefe   :  { %2723 = vrot.lane.b32.xlu1 %v2710_v21, %s5194_s18  ;;  %v3921_v21 = vld [vmem:[%s5175_s12 + $0x70] sm:$0xff] }
 0xeff   :  { %v4233_v24 = vpop.f32.mrf.mxu1 }
 0xf00   :  { %v3918_v24 = vld [vmem:[%s5175_s12 + $0x58] sm:$0xff] }
 0xf01   :  { %v2891_v25 = vpop.f32.mrf.mxu1 }
 0xf03   :  { %v4243_v26 = vpop.f32.mrf.mxu1 }
 0xf04   :  { %v3916_v26 = vld [vmem:[%s5175_s12 + $0x48] sm:$0xff] }
 0xf05   :  { %v3058_v27 = vpop.f32.mrf.mxu1 }
 0xf06   :  { %3397 = vrot.lane.b32.xlu0 %v3058_v27, %s4460_s20  ;;  %v3915_v27 = vld [vmem:[%s5175_s12 + $0x40] sm:$0xff] }
 0xf07   :  { %v4253_v28 = vpop.f32.mrf.mxu1 }
 0xf08   :  { %v3912_v28 = vld [vmem:[%s5174_s11 + $0x1] ss:$0 sm:$0xff] }
 0xf09   :  { %v3225_v39 = vpop.f32.mrf.mxu1 }
 0xf0a   :  { %3401 = vrot.lane.b32.xlu0 %v3225_v39, %s5193_s28 }
 0xf0b   :  { %v4263_v29 = vpop.f32.mrf.mxu1 }
 0xf0d   :  { %v3392_v30 = vpop.f32.mrf.mxu1 }
 0xf0e   :  { %3405 = vrot.lane.b32.xlu1 %v3392_v30, %s5194_s18 }
 0xf0f   :  { %v4273_v6 = vpop.f32.mrf.mxu1 }
 0xf3b   :  { %v2716_v32 = vpop.permute.xlu0 %2715 }
 0xf3c   :  { %v2726_v36 = vsel %vm198_vm2, %v2209_v13, %v2716_v32  ;;  %v3906_v13 = vld [vmem:[%s5172_s9 + $0x1] ss:$0 sm:$0xff] }
 0xf6c   :  { %v2720_v35 = vpop.permute.xlu1 %2719 }
 0xf6d   :  { %v2727_v37 = vsel %vm880_vm3, %v2726_v36, %v2720_v35 }
 0xf70   :  { %v2724_v40 = vpop.permute.xlu1 %2723 }
 0xf71   :  { %v2728_v41 = vsel %vm882_vm4, %v2727_v37, %v2724_v40 }
 0xf72   :  { %4282 = vmatprep.mubr.msk.f32.mxu0 %vm58_vm0, %v2728_v41 }
 0xf78   :  { %v3398_v42 = vpop.permute.xlu0 %3397 }
 0xf79   :  { %v3408_v44 = vsel %vm198_vm2, %v2891_v25, %v3398_v42  ;;  %v3917_v25 = vld [vmem:[%s5175_s12 + $0x50] sm:$0xff] }
 0xf7c   :  { %v3402_v43 = vpop.permute.xlu0 %3401 }
 0xf7d   :  { %v3409_v45 = vsel %vm880_vm3, %v3408_v44, %v3402_v43 }
 0xf80   :  { %v3406_v33 = vpop.permute.xlu1 %3405 }
 0xf81   :  { %v3410_v31 = vsel %vm882_vm4, %v3409_v45, %v3406_v33  ;;  %v3924_v33 = vld [vmem:[%s5176_s13 + $0x1] ss:$0 sm:$0xff] }
 0xf82   :  { %4283 = vmatmul.mubr.msk.f32.vlgmr.msra.gmra.mxu0 %vm58_vm0, %v3410_v31 }
 0xf83   :  { %4297 = vmatpush3.msra.mxu0 %v3922_v34 }
 0xf84   :  { %4298 = vmatprep.subr.mxu0 %v3921_v21 }
 0xf85   :  { %4299 = vmatpush3.msra.mxu0 %v3921_v21 }
 0xf86   :  { %4300 = vmatprep.subr.mxu0 %v3920_v22 }
 0xf87   :  { %4301 = vmatpush3.msra.mxu0 %v3920_v22 }
 0xf88   :  { %4302 = vmatprep.subr.mxu0 %v3919_v23 }
 0xf89   :  { %4303 = vmatpush3.msra.mxu0 %v3919_v23 }
 0xf8a   :  { %4304 = vmatprep.subr.mxu0 %v3918_v24 }
 0xf8b   :  { %4305 = vmatpush3.msra.mxu0 %v3918_v24 }
 0xf8c   :  { %4306 = vmatprep.subr.mxu0 %v3917_v25 }
 0xf8d   :  { %4307 = vmatpush3.msra.mxu0 %v3917_v25 }
 0xf8e   :  { %4308 = vmatprep.subr.mxu0 %v3916_v26 }
 0xf8f   :  { %4309 = vmatpush3.msra.mxu0 %v3916_v26 }
 0xf90   :  { %4310 = vmatprep.subr.mxu0 %v3915_v27 }
 0xf91   :  { %4311 = vmatpush3.msra.mxu0 %v3915_v27 }
0x1042   :  { %v4284_v47 = vpop.f32.mrf.mxu0 }
0x1043   :  { %v3502_v48 = vadd.f32 %v4284_v47, %v3900_v46 }
0x1044   :  { %v3496_v49 = vpop.f32.mrf.mxu0 }
0x1045   :  { %v3506_v50 = vadd.f32 %v3502_v48, %v4885_v2  ;;  %v3497_v51 = vadd.f32 %v3900_v46, %v3496_v49 }
0x1047   :  { %v3505_v52 = vadd.f32 %v3497_v51, %v4883_v1  ;;  %v3514_v53 = vsel %vm58_vm0, %v3506_v50, 0.0  ;;  %v3910_v1 = vld [vmem:[%s5173_s10 + $0x38] sm:$0xff] }
0x1048   :  { %3515 = vadd.xlane.f32.xlu1 %v3514_v53  ;;  %4285 = vmatprep.subr.mxu1 %v3910_v1 }
0x1049   :  { %v3511_v38 = vsel %vm58_vm0, %v3505_v52, 0.0  ;;  %4286 = vmatpush3.msra.mxu1 %v3910_v1 }
0x104a   :  { %3512 = vadd.xlane.f32.xlu0 %v3511_v38  ;;  %4287 = vmatprep.subr.mxu1 %v3909_v63 }
0x104b   :  { %4288 = vmatpush3.msra.mxu1 %v3909_v63 }
0x104c   :  { %4289 = vmatprep.subr.mxu1 %v3908_v0 }
0x104d   :  { %4290 = vmatpush3.msra.mxu1 %v3908_v0 }
0x104e   :  { %4291 = vmatprep.subr.mxu1 %v3907_v3 }
0x104f   :  { %4292 = vmatpush3.msra.mxu1 %v3907_v3 }
0x10d1   :  { %v3516_v54 = vpop.xlane.xlu1 %3515 }
0x10d2   :  { %v3518_v58 = vmul.f32 0.03125, %v3516_v54 }
0x10d3   :  { %v3513_v55 = vpop.xlane.xlu0 %3512 }
0x10d4   :  { %v3517_v56 = vmul.f32 0.03125, %v3513_v55  ;;  %v3520_v57 = vsub.f32 %v3506_v50, %v3518_v58 }
0x10d6   :  { %v3519_v59 = vsub.f32 %v3505_v52, %v3517_v56  ;;  %v3522_v62 = vmul.f32 %v3520_v57, %v3520_v57 }
0x10d8   :  { %v3521_v60 = vmul.f32 %v3519_v59, %v3519_v59  ;;  %v3526_v2 = vsel %vm58_vm0, %v3522_v62, 0.0 }
0x10da   :  { %v3523_v61 = vsel %vm58_vm0, %v3521_v60, 0.0 }
0x10db   :  { %3524 = vadd.xlane.f32.xlu0 %v3523_v61 }
0x10df   :  { %3527 = vadd.xlane.f32.xlu0 %v3526_v2 }
0x1164   :  { %v3525_v4 = vpop.xlane.xlu0 %3524 }
0x1165   :  { %v3529_v5 = vmul.f32 0.03125, %v3525_v4 }
0x1167   :  { %v3531_v7 = vadd.f32 1e-05, %v3529_v5  ;;  %v3929_v5 = vld [vmem:[%s5177_s14 + $0x1] ss:$0 sm:$0xff] }
0x1168   :  { %v3528_v8 = vpop.xlane.xlu0 %3527 }
0x1169   :  { %4413 = vrsqrt.f32 %v3531_v7  ;;  %v3530_v15 = vmul.f32 0.03125, %v3528_v8 }
0x116b   :  { %v3532_v9 = vadd.f32 1e-05, %v3530_v15  ;;  %v3930_v15 = vld [vmem:[%s5178_s15 + $0x1] ss:$0 sm:$0xff] }
0x116d   :  { %4415 = vrsqrt.f32 %v3532_v9 }
0x1176   :  { %v4414_v10 = vpop.eup %4413 }
0x1177   :  { %v3535_v12 = vmul.f32 %v4414_v10, %v3519_v59 }
0x1179   :  { %v3543_v14 = vmul.f32 %v3905_v11, %v3535_v12 }
0x117a   :  { %v4416_v16 = vpop.eup %4415 }
0x117b   :  { %v3536_v17 = vmul.f32 %v4416_v16, %v3520_v57  ;;  %v3551_v18 = vadd.f32 %v3906_v13, %v3543_v14 }
0x117d   :  { %v3544_v19 = vmul.f32 %v3905_v11, %v3536_v17  ;;  %4293 = vmatprep.mubr.msk.f32.mxu1 %vm58_vm0, %v3551_v18 }
0x117f   :  { %v3552_v20 = vadd.f32 %v3906_v13, %v3544_v19 }
0x1181   :  { %4294 = vmatmul.mubr.msk.f32.vlgmr.msra.gmra.mxu1 %vm58_vm0, %v3552_v20 }
0x1241   :  { %v4295_v39 = vpop.f32.mrf.mxu1 }
0x1242   :  { %v3644_v29 = vadd.f32 %v4295_v39, %v3912_v28 }
0x1243   :  { %v3638_v30 = vpop.f32.mrf.mxu1 }
0x1244   :  { %v3650_v6 = vmul.f32 0.70710677, %v3644_v29  ;;  %v3639_v32 = vadd.f32 %v3912_v28, %v3638_v30  ;;  %v3648_v43 = vmul.f32 0.5, %v3644_v29 }
0x1246   :  { %4417 = verf.f32 %v3650_v6  ;;  %v3649_v35 = vmul.f32 0.70710677, %v3639_v32  ;;  %v3647_v41 = vmul.f32 0.5, %v3639_v32 }
0x1248   :  { %4419 = verf.f32 %v3649_v35 }
0x1253   :  { %v4418_v36 = vpop.eup %4417 }
0x1254   :  { %v3654_v40 = vadd.f32 1.0, %v4418_v36 }
0x1255   :  { %v4420_v37 = vpop.eup %4419 }
0x1256   :  { %v3653_v42 = vadd.f32 1.0, %v4420_v37  ;;  %v3656_v45 = vmul.f32 %v3654_v40, %v3648_v43 }
0x1258   :  { %v3655_v44 = vmul.f32 %v3653_v42, %v3647_v41 }
0x125a   :  { %4312 = vmatprep.mubr.msk.f32.mxu0 %vm1825_vm5, %v3655_v44 }
0x125b   :  { %4313 = vmatmul.mubr.msk.f32.vlgmr.msra.gmra.mxu0 %vm1825_vm5, %v3656_v45 }
0x131b   :  { %v4314_v31 = vpop.f32.mrf.mxu0 }
0x131c   :  { %v3752_v46 = vadd.f32 %v4314_v31, %v3924_v33 }
0x131d   :  { %v3746_v47 = vpop.f32.mrf.mxu0 }
0x131e   :  { %v3756_v48 = vadd.f32 %v3752_v46, %v3552_v20  ;;  %v3747_v49 = vadd.f32 %v3924_v33, %v3746_v47 }
0x1320   :  { %v3755_v50 = vadd.f32 %v3747_v49, %v3551_v18  ;;  %v3764_v51 = vsel %vm58_vm0, %v3756_v48, 0.0 }
0x1321   :  { %3765 = vadd.xlane.f32.xlu1 %v3764_v51 }
0x1322   :  { %v3761_v52 = vsel %vm58_vm0, %v3755_v50, 0.0 }
0x1323   :  { %3762 = vadd.xlane.f32.xlu0 %v3761_v52 }
0x13aa   :  { %v3766_v53 = vpop.xlane.xlu1 %3765 }
0x13ab   :  { %v3768_v38 = vmul.f32 0.03125, %v3766_v53 }
0x13ac   :  { %v3763_v54 = vpop.xlane.xlu0 %3762 }
0x13ad   :  { %v3770_v58 = vsub.f32 %v3756_v48, %v3768_v38  ;;  %v3767_v55 = vmul.f32 0.03125, %v3763_v54 }
0x13af   :  { %v3769_v56 = vsub.f32 %v3755_v50, %v3767_v55  ;;  %v3772_v57 = vmul.f32 %v3770_v58, %v3770_v58 }
0x13b1   :  { %v3776_v59 = vsel %vm58_vm0, %v3772_v57, 0.0  ;;  %v3771_v60 = vmul.f32 %v3769_v56, %v3769_v56 }
0x13b2   :  { %3777 = vadd.xlane.f32.xlu1 %v3776_v59 }
0x13b3   :  { %v3773_v61 = vsel %vm58_vm0, %v3771_v60, 0.0 }
0x13b4   :  { %3774 = vadd.xlane.f32.xlu0 %v3773_v61 }
0x143b   :  { %v3778_v62 = vpop.xlane.xlu1 %3777 }
0x143c   :  { %v3780_v2 = vmul.f32 0.03125, %v3778_v62 }
0x143d   :  { %v3775_v1 = vpop.xlane.xlu0 %3774 }
0x143e   :  { %v3782_v63 = vadd.f32 1e-05, %v3780_v2  ;;  %v3779_v0 = vmul.f32 0.03125, %v3775_v1 }
0x1440   :  { %4421 = vrsqrt.f32 %v3782_v63  ;;  %v3781_v3 = vadd.f32 1e-05, %v3779_v0 }
0x1442   :  { %4423 = vrsqrt.f32 %v3781_v3 }
0x144d   :  { %v4422_v4 = vpop.eup %4421 }
0x144e   :  { %v3786_v7 = vmul.f32 %v4422_v4, %v3770_v58 }
0x144f   :  { %v4424_v8 = vpop.eup %4423 }
0x1450   :  { %v3785_v9 = vmul.f32 %v4424_v8, %v3769_v56  ;;  %v3794_v10 = vmul.f32 %v3929_v5, %v3786_v7 }
0x1452   :  { %v3793_v11 = vmul.f32 %v3929_v5, %v3785_v9  ;;  %v3802_v12 = vadd.f32 %v3930_v15, %v3794_v10 }
0x1454   :  { %v3801_v13 = vadd.f32 %v3930_v15, %v3793_v11  ;;  %3804 = vst.msk [vmem:[#allocation2 + $0x8] sm:$0xff] %vm58_vm0, %v3802_v12 }
0x1456   :  { %3803 = vst.msk [vmem:[#allocation2] sm:$0xff] %vm58_vm0, %v3801_v13 }
0x1457   :  { %4436 = shalt.err (!%p4433_p4)
}
0x1458   :  { %s4464_s14 = smov 128  }
0x1459   :  { %3816 = dma.vmem_to_hbm [thread:$0]  %s3811_s25, 256, %s5179_s16, [#allocation3], %s4464_s14, %s4464_s14, %s4460_s20  }
0x145a   :  { %4445 = dma.done.wait [#allocation3], 256  }
0x145b   :  { %4446 = vsyncadd [#allocation3], 4294967040 }
0x145c   :  { %3820 = vsyncpa [#allocation3], 1 }

</bundles_post_ra>
